<compile_context>
chip_gen: v6e
topology: v6e:2x2x1
jax: 0.10.0
libtpu: 0.0.40
codegen_flags: <defaults>
</compile_context>

<pallas_src>
import functools
import math

import numpy as np

import jax
import jax.numpy as jnp
from jax.experimental import pallas as pl
from jax.experimental.pallas import tpu as pltpu


VMEM_LIMIT_BYTES = 32 * 1024 * 1024  # safe on v5e/v6e/v7x scoped VMEM
LN_EPS = 1e-5                        # PyTorch LayerNorm default


# ----------------------------------------------------------------------------
# Tile-size helpers (block last dim must be a multiple of 128 or the full dim;
# second-last a multiple of 8 or the full dim).
# ----------------------------------------------------------------------------

def _row_tile(m, target=256):
    if m <= target:
        return m
    for t in range(target, 7, -8):
        if m % t == 0:
            return t
    return m


def _col_tile(n, target=512):
    if n <= target:
        return n
    for t in range(target, 127, -128):
        if n % t == 0:
            return t
    return n


def _cparams(sem):
    return pltpu.CompilerParams(dimension_semantics=sem,
                                vmem_limit_bytes=VMEM_LIMIT_BYTES)


# ----------------------------------------------------------------------------
# Pallas kernels
# ----------------------------------------------------------------------------

def _matmul_bias_kernel(x_ref, w_ref, b_ref, o_ref, *, compute_dtype):
    # y = x @ W + b    x:(tm,K)  W:(K,tn)  b:(1,tn)
    x = x_ref[...].astype(compute_dtype)
    w = w_ref[...].astype(compute_dtype)
    o_ref[...] = (
        jnp.dot(x, w, preferred_element_type=jnp.float32) + b_ref[...]
    )


def matmul_bias(x, w, b, compute_dtype):
    M, K = x.shape
    N = w.shape[1]
    tm = _row_tile(M)
    tn = _col_tile(N)
    kernel = functools.partial(_matmul_bias_kernel, compute_dtype=compute_dtype)
    return pl.pallas_call(
        kernel,
        out_shape=jax.ShapeDtypeStruct((M, N), jnp.float32),
        grid=(M // tm, N // tn),
        in_specs=[
            pl.BlockSpec((tm, K), lambda i, j: (i, 0)),
            pl.BlockSpec((K, tn), lambda i, j: (0, j)),
            pl.BlockSpec((1, tn), lambda i, j: (0, j)),
        ],
        out_specs=pl.BlockSpec((tm, tn), lambda i, j: (i, j)),
        compiler_params=_cparams(("parallel", "parallel")),
    )(x, w, b.reshape(1, N))


def _proj_add_ln_kernel(x_ref, w_ref, b_ref, res_ref, g_ref, beta_ref, o_ref,
                        *, compute_dtype):
    # o = LayerNorm(res + x @ W + b)   (output projection + residual + LN fused)
    x = x_ref[...].astype(compute_dtype)
    w = w_ref[...].astype(compute_dtype)
    y = jnp.dot(x, w, preferred_element_type=jnp.float32) + b_ref[...]
    z = res_ref[...] + y
    mean = jnp.mean(z, axis=-1, keepdims=True)
    c = z - mean
    var = jnp.mean(c * c, axis=-1, keepdims=True)
    o_ref[...] = c * jax.lax.rsqrt(var + LN_EPS) * g_ref[...] + beta_ref[...]


def proj_add_ln(x, w, b, res, gamma, beta, compute_dtype):
    M, K = x.shape
    D = w.shape[1]
    tm = _row_tile(M)
    kernel = functools.partial(_proj_add_ln_kernel, compute_dtype=compute_dtype)
    return pl.pallas_call(
        kernel,
        out_shape=jax.ShapeDtypeStruct((M, D), jnp.float32),
        grid=(M // tm,),
        in_specs=[
            pl.BlockSpec((tm, K), lambda i: (i, 0)),
            pl.BlockSpec((K, D), lambda i: (0, 0)),
            pl.BlockSpec((1, D), lambda i: (0, 0)),
            pl.BlockSpec((tm, D), lambda i: (i, 0)),
            pl.BlockSpec((1, D), lambda i: (0, 0)),
            pl.BlockSpec((1, D), lambda i: (0, 0)),
        ],
        out_specs=pl.BlockSpec((tm, D), lambda i: (i, 0)),
        compiler_params=_cparams(("parallel",)),
    )(x, w, b.reshape(1, D), res, gamma.reshape(1, D), beta.reshape(1, D))


def _ffn_add_ln_kernel(x_ref, w1_ref, b1_ref, w2_ref, b2_ref, g_ref, beta_ref,
                       o_ref, acc_ref, *, compute_dtype):
    # Streams the PF dimension: acc += relu(x @ W1[:,k] + b1[k]) @ W2[k,:]
    # Finalize: o = LayerNorm(x + acc + b2)
    k = pl.program_id(1)

    @pl.when(k == 0)
    def _():
        acc_ref[...] = jnp.zeros_like(acc_ref)

    x = x_ref[...].astype(compute_dtype)
    h = (
        jnp.dot(x, w1_ref[...].astype(compute_dtype),
                preferred_element_type=jnp.float32)
        + b1_ref[...]
    )
    h = jnp.maximum(h, 0.0)
    acc_ref[...] += jnp.dot(h.astype(compute_dtype),
                            w2_ref[...].astype(compute_dtype),
                            preferred_element_type=jnp.float32)

    @pl.when(k == pl.num_programs(1) - 1)
    def _():
        z = x_ref[...] + acc_ref[...] + b2_ref[...]
        mean = jnp.mean(z, axis=-1, keepdims=True)
        c = z - mean
        var = jnp.mean(c * c, axis=-1, keepdims=True)
        o_ref[...] = c * jax.lax.rsqrt(var + LN_EPS) * g_ref[...] + beta_ref[...]


def ffn_add_ln(x, w1, b1, w2, b2, gamma, beta, compute_dtype):
    M, D = x.shape
    PF = w1.shape[1]
    tm = _row_tile(M)
    tpf = _col_tile(PF)
    kernel = functools.partial(_ffn_add_ln_kernel, compute_dtype=compute_dtype)
    return pl.pallas_call(
        kernel,
        out_shape=jax.ShapeDtypeStruct((M, D), jnp.float32),
        grid=(M // tm, PF // tpf),
        in_specs=[
            pl.BlockSpec((tm, D), lambda i, k: (i, 0)),
            pl.BlockSpec((D, tpf), lambda i, k: (0, k)),
            pl.BlockSpec((1, tpf), lambda i, k: (0, k)),
            pl.BlockSpec((tpf, D), lambda i, k: (k, 0)),
            pl.BlockSpec((1, D), lambda i, k: (0, 0)),
            pl.BlockSpec((1, D), lambda i, k: (0, 0)),
            pl.BlockSpec((1, D), lambda i, k: (0, 0)),
        ],
        out_specs=pl.BlockSpec((tm, D), lambda i, k: (i, 0)),
        scratch_shapes=[pltpu.VMEM((tm, D), jnp.float32)],
        compiler_params=_cparams(("parallel", "arbitrary")),
    )(x, w1, b1.reshape(1, PF), w2, b2.reshape(1, D),
      gamma.reshape(1, D), beta.reshape(1, D))


def _attn_body(q_ref, k_ref, v_ref, inv_scale, compute_dtype):
    q = q_ref[0].astype(compute_dtype)   # (H, Lq, Dh)
    k = k_ref[0].astype(compute_dtype)   # (H, Lk, Dh)
    v = v_ref[0].astype(compute_dtype)   # (H, Lk, Dh)
    # Contract last dims directly (no materialized K transpose).
    s = jnp.einsum("hqd,hkd->hqk", q, k,
                   preferred_element_type=jnp.float32) * inv_scale
    s = s - jnp.max(s, axis=-1, keepdims=True)
    e = jnp.exp(s)
    denom = jnp.sum(e, axis=-1, keepdims=True)
    p = e * pl.reciprocal(denom, approx=True)
    o = jnp.einsum("hqk,hkd->hqd", p.astype(compute_dtype), v,
                   preferred_element_type=jnp.float32)
    return o, p


def _attn_kernel(q_ref, k_ref, v_ref, o_ref, *, inv_scale, compute_dtype):
    o, _ = _attn_body(q_ref, k_ref, v_ref, inv_scale, compute_dtype)
    o_ref[0] = o


def _attn_kernel_with_probs(q_ref, k_ref, v_ref, o_ref, a_ref,
                            *, inv_scale, compute_dtype):
    o, p = _attn_body(q_ref, k_ref, v_ref, inv_scale, compute_dtype)
    a_ref[0] = p
    o_ref[0] = o


def scaled_dot_product_attention(q, k, v, inv_scale, need_attn, compute_dtype):
    # q: (B, H, Lq, Dh), k/v: (B, H, Lk, Dh); one batch (all heads) per step.
    B, H, Lq, Dh = q.shape
    Lk = k.shape[2]
    in_specs = [
        pl.BlockSpec((1, H, Lq, Dh), lambda b: (b, 0, 0, 0)),
        pl.BlockSpec((1, H, Lk, Dh), lambda b: (b, 0, 0, 0)),
        pl.BlockSpec((1, H, Lk, Dh), lambda b: (b, 0, 0, 0)),
    ]
    if need_attn:
        kernel = functools.partial(_attn_kernel_with_probs,
                                   inv_scale=inv_scale,
                                   compute_dtype=compute_dtype)
        out, attn = pl.pallas_call(
            kernel,
            out_shape=(
                jax.ShapeDtypeStruct((B, H, Lq, Dh), jnp.float32),
                jax.ShapeDtypeStruct((B, H, Lq, Lk), jnp.float32),
            ),
            grid=(B,),
            in_specs=in_specs,
            out_specs=(
                pl.BlockSpec((1, H, Lq, Dh), lambda b: (b, 0, 0, 0)),
                pl.BlockSpec((1, H, Lq, Lk), lambda b: (b, 0, 0, 0)),
            ),
            compiler_params=_cparams(("parallel",)),
        )(q, k, v)
        return out, attn
    else:
        kernel = functools.partial(_attn_kernel,
                                   inv_scale=inv_scale,
                                   compute_dtype=compute_dtype)
        out = pl.pallas_call(
            kernel,
            out_shape=jax.ShapeDtypeStruct((B, H, Lq, Dh), jnp.float32),
            grid=(B,),
            in_specs=in_specs,
            out_specs=pl.BlockSpec((1, H, Lq, Dh), lambda b: (b, 0, 0, 0)),
            compiler_params=_cparams(("parallel",)),
        )(q, k, v)
        return out, None


# ----------------------------------------------------------------------------
# Module logic (glue in plain JAX, hot paths in Pallas kernels above)
# ----------------------------------------------------------------------------

def multi_head_attention_core(p, query, key, value, n_heads, *, need_attn,
                              compute_dtype):
    """Q/K/V projections + attention. Returns (concat-heads flat (B*Lq, D), probs)."""
    B, Lq, D = query.shape
    Lk = key.shape[1]
    Dh = D // n_heads
    inv_scale = 1.0 / math.sqrt(Dh)

    q_flat_in = query.reshape(B * Lq, D)
    if key is value:
        if query is key:
            # self-attention: fused QKV projection (one wide matmul)
            w_qkv = jnp.concatenate([p["wq"], p["wk"], p["wv"]], axis=1)
            b_qkv = jnp.concatenate([p["bq"], p["bk"], p["bv"]])
            qkv = matmul_bias(q_flat_in, w_qkv, b_qkv, compute_dtype)
            q, k, v = qkv[:, :D], qkv[:, D:2 * D], qkv[:, 2 * D:]
        else:
            # cross-attention: fused KV projection on enc_src
            q = matmul_bias(q_flat_in, p["wq"], p["bq"], compute_dtype)
            w_kv = jnp.concatenate([p["wk"], p["wv"]], axis=1)
            b_kv = jnp.concatenate([p["bk"], p["bv"]])
            kv = matmul_bias(key.reshape(B * Lk, D), w_kv, b_kv, compute_dtype)
            k, v = kv[:, :D], kv[:, D:]
    else:
        q = matmul_bias(q_flat_in, p["wq"], p["bq"], compute_dtype)
        k = matmul_bias(key.reshape(B * Lk, D), p["wk"], p["bk"], compute_dtype)
        v = matmul_bias(value.reshape(B * Lk, D), p["wv"], p["bv"], compute_dtype)

    # split heads -> (B, H, L, Dh)
    qh = q.reshape(B, Lq, n_heads, Dh).transpose(0, 2, 1, 3)
    kh = k.reshape(B, Lk, n_heads, Dh).transpose(0, 2, 1, 3)
    vh = v.reshape(B, Lk, n_heads, Dh).transpose(0, 2, 1, 3)

    o, attn = scaled_dot_product_attention(qh, kh, vh, inv_scale, need_attn,
                                           compute_dtype)

    # merge heads -> (B*Lq, D); output projection is fused with add+LN outside.
    o_flat = o.transpose(0, 2, 1, 3).reshape(B * Lq, D)
    return o_flat, attn


def decoder_layer(params, trg, enc_src, n_heads, compute_dtype=jnp.float32):
    B, Lt, D = trg.shape
    trg_flat = trg.reshape(B * Lt, D)

    # self attention (+ fused output-proj + residual + LN); probs discarded.
    sa = params["self_attn"]
    o_flat, _ = multi_head_attention_core(
        sa, trg, trg, trg, n_heads, need_attn=False, compute_dtype=compute_dtype)
    trg_flat = proj_add_ln(o_flat, sa["wo"], sa["bo"], trg_flat,
                           params["ln1_g"], params["ln1_b"], compute_dtype)
    trg = trg_flat.reshape(B, Lt, D)

    # encoder (cross) attention (+ fused output-proj + residual + LN).
    ca = params["enc_attn"]
    o_flat, attention = multi_head_attention_core(
        ca, trg, enc_src, enc_src, n_heads, need_attn=True,
        compute_dtype=compute_dtype)
    trg_flat = proj_add_ln(o_flat, ca["wo"], ca["bo"], trg_flat,
                           params["ln2_g"], params["ln2_b"], compute_dtype)

    # feedforward (+ fused residual + LN), PF streamed with VMEM accumulator.
    trg_flat = ffn_add_ln(trg_flat,
                          params["ff_w1"], params["ff_b1"],
                          params["ff_w2"], params["ff_b2"],
                          params["ln3_g"], params["ln3_b"], compute_dtype)

    return trg_flat.reshape(B, Lt, D), attention


# ----------------------------------------------------------------------------
# Deterministic parameter init
# ----------------------------------------------------------------------------

def init_params(key, hid_dim, pf_dim):
    ks = jax.random.split(key, 16)
    s = 0.02

    def mha_params(k4):
        k = jax.random.split(k4, 4)
        return {
            "wq": jax.random.normal(k[0], (hid_dim, hid_dim), jnp.float32) * s,
            "bq": jnp.zeros((hid_dim,), jnp.float32),
            "wk": jax.random.normal(k[1], (hid_dim, hid_dim), jnp.float32) * s,
            "bk": jnp.zeros((hid_dim,), jnp.float32),
            "wv": jax.random.normal(k[2], (hid_dim, hid_dim), jnp.float32) * s,
            "bv": jnp.zeros((hid_dim,), jnp.float32),
            "wo": jax.random.normal(k[3], (hid_dim, hid_dim), jnp.float32) * s,
            "bo": jnp.zeros((hid_dim,), jnp.float32),
        }

    return {
        "self_attn": mha_params(ks[0]),
        "enc_attn": mha_params(ks[1]),
        "ln1_g": jnp.ones((hid_dim,), jnp.float32),
        "ln1_b": jnp.zeros((hid_dim,), jnp.float32),
        "ln2_g": jnp.ones((hid_dim,), jnp.float32),
        "ln2_b": jnp.zeros((hid_dim,), jnp.float32),
        "ln3_g": jnp.ones((hid_dim,), jnp.float32),
        "ln3_b": jnp.zeros((hid_dim,), jnp.float32),
        "ff_w1": jax.random.normal(ks[2], (hid_dim, pf_dim), jnp.float32) * s,
        "ff_b1": jnp.zeros((pf_dim,), jnp.float32),
        "ff_w2": jax.random.normal(ks[3], (pf_dim, hid_dim), jnp.float32) * s,
        "ff_b2": jnp.zeros((hid_dim,), jnp.float32),
    }


# ----------------------------------------------------------------------------
# Pure-JAX reference (for a sanity check)
# ----------------------------------------------------------------------------

def _ref_ln(z, g, b):
    m = jnp.mean(z, axis=-1, keepdims=True)
    v = jnp.mean((z - m) ** 2, axis=-1, keepdims=True)
    return (z - m) / jnp.sqrt(v + LN_EPS) * g + b


def _ref_mha(p, q_in, k_in, v_in, n_heads):
    B, Lq, D = q_in.shape
    Lk = k_in.shape[1]
    Dh = D // n_heads
    q = q_in @ p["wq"] + p["bq"]
    k = k_in @ p["wk"] + p["bk"]
    v = v_in @ p["wv"] + p["bv"]
    q = q.reshape(B, Lq, n_heads, Dh).transpose(0, 2, 1, 3)
    k = k.reshape(B, Lk, n_heads, Dh).transpose(0, 2, 1, 3)
    v = v.reshape(B, Lk, n_heads, Dh).transpose(0, 2, 1, 3)
    s = jnp.einsum("bhqd,bhkd->bhqk", q, k) / np.sqrt(Dh)
    a = jax.nn.softmax(s, axis=-1)
    o = jnp.einsum("bhqk,bhkd->bhqd", a, v)
    o = o.transpose(0, 2, 1, 3).reshape(B, Lq, D)
    return o @ p["wo"] + p["bo"], a


def _ref_decoder(params, trg, enc_src, n_heads):
    _t, _ = _ref_mha(params["self_attn"], trg, trg, trg, n_heads)
    trg = _ref_ln(trg + _t, params["ln1_g"], params["ln1_b"])
    _t, attn = _ref_mha(params["enc_attn"], trg, enc_src, enc_src, n_heads)
    trg = _ref_ln(trg + _t, params["ln2_g"], params["ln2_b"])
    h = jnp.maximum(trg @ params["ff_w1"] + params["ff_b1"], 0.0)
    _t = h @ params["ff_w2"] + params["ff_b2"]
    trg = _ref_ln(trg + _t, params["ln3_g"], params["ln3_b"])
    return trg, attn


# ----------------------------------------------------------------------------

if __name__ == "__main__":
    B, Lt, Ls = 2, 8, 8
    hid_dim, n_heads, pf_dim = 32, 4, 64

    key = jax.random.PRNGKey(0)
    k_trg, k_src, k_par = jax.random.split(key, 3)
    trg = jax.random.normal(k_trg, (B, Lt, hid_dim), jnp.float32)
    enc_src = jax.random.normal(k_src, (B, Ls, hid_dim), jnp.float32)
    params = init_params(k_par, hid_dim, pf_dim)

    fwd = jax.jit(decoder_layer, static_argnums=(3,))
    out, attention = fwd(params, trg, enc_src, n_heads)
    out = jax.block_until_ready(out)
    attention = jax.block_until_ready(attention)

    assert out.shape == (B, Lt, hid_dim)
    assert attention.shape == (B, n_heads, Lt, Ls)

    ref_out, ref_attn = _ref_decoder(params, trg, enc_src, n_heads)
    np.testing.assert_allclose(np.asarray(out), np.asarray(ref_out),
                               rtol=2e-2, atol=2e-2)
    np.testing.assert_allclose(np.asarray(attention), np.asarray(ref_attn),
                               rtol=2e-2, atol=2e-2)

    print("KERNEL_OK")
</pallas_src>

<mosaic_0001>
module attributes {stable_mosaic.version = 11 : i64} {
  func.func @_matmul_bias_kernel(%arg0: i32, %arg1: i32, %arg2: memref<16x32xf32, #tpu.memory_space<vmem>>, %arg3: memref<32x96xf32, #tpu.memory_space<vmem>>, %arg4: memref<1x96xf32, #tpu.memory_space<vmem>>, %arg5: memref<16x96xf32, #tpu.memory_space<vmem>>) attributes {dimension_semantics = [#tpu.dimension_semantics<parallel>, #tpu.dimension_semantics<parallel>], iteration_bounds = array<i64: 1, 1>, scalar_prefetch = 0 : i64, scratch_operands = 0 : i64, tpu.core_type = #tpu.core_type<tc>, window_params = [{transform_indices = @transform_0, window_bounds = array<i64: 16, 32>}, {transform_indices = @transform_1, window_bounds = array<i64: 32, 96>}, {transform_indices = @transform_2, window_bounds = array<i64: 1, 96>}, {transform_indices = @transform_3, window_bounds = array<i64: 16, 96>}]} {
    %c0 = arith.constant 0 : index
    %c0_0 = arith.constant 0 : index
    %0 = vector.load %arg2[%c0, %c0_0] : memref<16x32xf32, #tpu.memory_space<vmem>>, vector<16x32xf32>
    %c0_1 = arith.constant 0 : index
    %c0_2 = arith.constant 0 : index
    %1 = vector.load %arg3[%c0_1, %c0_2] : memref<32x96xf32, #tpu.memory_space<vmem>>, vector<32x96xf32>
    %cst = arith.constant dense<0.000000e+00> : vector<16x96xf32>
    %2 = tpu.matmul %0, %1, %cst {dimension_numbers = #tpu.dot_dimension_numbers<[1], [0], [0], [1], [0, 0, 1, 1], [], []>} : vector<16x32xf32>, vector<32x96xf32>, vector<16x96xf32> -> vector<16x96xf32>
    %c0_3 = arith.constant 0 : index
    %c0_4 = arith.constant 0 : index
    %3 = vector.load %arg4[%c0_3, %c0_4] : memref<1x96xf32, #tpu.memory_space<vmem>>, vector<1x96xf32>
    %4 = vector.broadcast %3 : vector<1x96xf32> to vector<16x96xf32>
    %5 = arith.addf %2, %4 : vector<16x96xf32>
    %c0_5 = arith.constant 0 : index
    %c0_6 = arith.constant 0 : index
    %6 = vector.load %arg5[%c0_5, %c0_6] : memref<16x96xf32, #tpu.memory_space<vmem>>, vector<16x96xf32>
    tpu.vector_store %arg5[%c0_5, %c0_6], %5 {strides = array<i32>} : memref<16x96xf32, #tpu.memory_space<vmem>>, vector<16x96xf32>,
    return
  }
  func.func @transform_0(%arg0: i32, %arg1: i32) -> (i32, i32) {
    %c0_i32 = arith.constant 0 : i32
    %c0_i32_0 = arith.constant 0 : i32
    return %arg0, %c0_i32 : i32, i32
  }
  func.func @transform_1(%arg0: i32, %arg1: i32) -> (i32, i32) {
    %c0_i32 = arith.constant 0 : i32
    %c0_i32_0 = arith.constant 0 : i32
    return %c0_i32, %arg1 : i32, i32
  }
  func.func @transform_2(%arg0: i32, %arg1: i32) -> (i32, i32) {
    %c0_i32 = arith.constant 0 : i32
    %c0_i32_0 = arith.constant 0 : i32
    return %c0_i32, %arg1 : i32, i32
  }
  func.func @transform_3(%arg0: i32, %arg1: i32) -> (i32, i32) {
    %c0_i32 = arith.constant 0 : i32
    return %arg0, %arg1 : i32, i32
  }
}

module attributes {stable_mosaic.version = 11 : i64} {
  func.func @_attn_kernel(%arg0: i32, %arg1: memref<1x4x8x8xf32, #tpu.memory_space<vmem>>, %arg2: memref<1x4x8x8xf32, #tpu.memory_space<vmem>>, %arg3: memref<1x4x8x8xf32, #tpu.memory_space<vmem>>, %arg4: memref<1x4x8x8xf32, #tpu.memory_space<vmem>>) attributes {dimension_semantics = [#tpu.dimension_semantics<parallel>], iteration_bounds = array<i64: 2>, scalar_prefetch = 0 : i64, scratch_operands = 0 : i64, tpu.core_type = #tpu.core_type<tc>, window_params = [{transform_indices = @transform_0, window_bounds = array<i64: 1, 4, 8, 8>}, {transform_indices = @transform_1, window_bounds = array<i64: 1, 4, 8, 8>}, {transform_indices = @transform_2, window_bounds = array<i64: 1, 4, 8, 8>}, {transform_indices = @transform_3, window_bounds = array<i64: 1, 4, 8, 8>}]} {
    %c0 = arith.constant 0 : index
    %c0_0 = arith.constant 0 : index
    %c0_1 = arith.constant 0 : index
    %c0_2 = arith.constant 0 : index
    %0 = vector.load %arg1[%c0, %c0_0, %c0_1, %c0_2] : memref<1x4x8x8xf32, #tpu.memory_space<vmem>>, vector<1x4x8x8xf32>
    %1 = vector.shape_cast %0 : vector<1x4x8x8xf32> to vector<4x8x8xf32>
    %c0_3 = arith.constant 0 : index
    %c0_4 = arith.constant 0 : index
    %c0_5 = arith.constant 0 : index
    %c0_6 = arith.constant 0 : index
    %2 = vector.load %arg2[%c0_3, %c0_4, %c0_5, %c0_6] : memref<1x4x8x8xf32, #tpu.memory_space<vmem>>, vector<1x4x8x8xf32>
    %3 = vector.shape_cast %2 : vector<1x4x8x8xf32> to vector<4x8x8xf32>
    %c0_7 = arith.constant 0 : index
    %c0_8 = arith.constant 0 : index
    %c0_9 = arith.constant 0 : index
    %c0_10 = arith.constant 0 : index
    %4 = vector.load %arg3[%c0_7, %c0_8, %c0_9, %c0_10] : memref<1x4x8x8xf32, #tpu.memory_space<vmem>>, vector<1x4x8x8xf32>
    %5 = vector.shape_cast %4 : vector<1x4x8x8xf32> to vector<4x8x8xf32>
    "tpu.trace_start"() <{level = 10 : i32, message = "hqd,hkd->hqk"}> : () -> ()
    %cst = arith.constant dense<0.000000e+00> : vector<4x8x8xf32>
    %6 = tpu.matmul %1, %3, %cst {dimension_numbers = #tpu.dot_dimension_numbers<[2], [2], [1], [1], [0, 0, 0, 1, 1, 1], [0], [0]>} : vector<4x8x8xf32>, vector<4x8x8xf32>, vector<4x8x8xf32> -> vector<4x8x8xf32>
    "tpu.trace_stop"() : () -> ()
    %cst_11 = arith.constant 0.353553385 : f32
    %7 = vector.broadcast %cst_11 : f32 to vector<4x8x8xf32>
    %8 = arith.mulf %6, %7 : vector<4x8x8xf32>
    %cst_12 = arith.constant dense<0xFF800000> : vector<4x8xf32>
    %9 = vector.multi_reduction <maximumf>, %8, %cst_12 [2] : vector<4x8x8xf32> to vector<4x8xf32>
    %10 = vector.shape_cast %9 : vector<4x8xf32> to vector<4x8x1xf32>
    %11 = vector.broadcast %10 : vector<4x8x1xf32> to vector<4x8x8xf32>
    %12 = arith.subf %8, %11 : vector<4x8x8xf32>
    %13 = math.exp %12 : vector<4x8x8xf32>
    %cst_13 = arith.constant dense<0.000000e+00> : vector<4x8xf32>
    %14 = vector.multi_reduction <add>, %13, %cst_13 [2] : vector<4x8x8xf32> to vector<4x8xf32>
    %15 = vector.shape_cast %14 : vector<4x8xf32> to vector<4x8x1xf32>
    %16 = tpu.reciprocal %15 {approx = true} : vector<4x8x1xf32> -> vector<4x8x1xf32>
    %17 = vector.broadcast %16 : vector<4x8x1xf32> to vector<4x8x8xf32>
    %18 = arith.mulf %13, %17 : vector<4x8x8xf32>
    "tpu.trace_start"() <{level = 10 : i32, message = "hqk,hkd->hqd"}> : () -> ()
    %cst_14 = arith.constant dense<0.000000e+00> : vector<4x8x8xf32>
    %19 = tpu.matmul %18, %5, %cst_14 {dimension_numbers = #tpu.dot_dimension_numbers<[2], [1], [1], [2], [0, 0, 0, 1, 1, 2], [0], [0]>} : vector<4x8x8xf32>, vector<4x8x8xf32>, vector<4x8x8xf32> -> vector<4x8x8xf32>
    "tpu.trace_stop"() : () -> ()
    %c0_15 = arith.constant 0 : index
    %c0_16 = arith.constant 0 : index
    %c0_17 = arith.constant 0 : index
    %c0_18 = arith.constant 0 : index
    %20 = vector.load %arg4[%c0_15, %c0_16, %c0_17, %c0_18] : memref<1x4x8x8xf32, #tpu.memory_space<vmem>>, vector<1x4x8x8xf32>
    %21 = vector.shape_cast %20 : vector<1x4x8x8xf32> to vector<4x8x8xf32>
    %22 = vector.shape_cast %19 : vector<4x8x8xf32> to vector<1x4x8x8xf32>
    tpu.vector_store %arg4[%c0_15, %c0_16, %c0_17, %c0_18], %22 {strides = array<i32>} : memref<1x4x8x8xf32, #tpu.memory_space<vmem>>, vector<1x4x8x8xf32>,
    return
  }
  func.func @transform_0(%arg0: i32) -> (i32, i32, i32, i32) {
    %c0_i32 = arith.constant 0 : i32
    %c0_i32_0 = arith.constant 0 : i32
    %c0_i32_1 = arith.constant 0 : i32
    %c0_i32_2 = arith.constant 0 : i32
    return %arg0, %c0_i32, %c0_i32_0, %c0_i32_1 : i32, i32, i32, i32
  }
  func.func @transform_1(%arg0: i32) -> (i32, i32, i32, i32) {
    %c0_i32 = arith.constant 0 : i32
    %c0_i32_0 = arith.constant 0 : i32
    %c0_i32_1 = arith.constant 0 : i32
    %c0_i32_2 = arith.constant 0 : i32
    return %arg0, %c0_i32, %c0_i32_0, %c0_i32_1 : i32, i32, i32, i32
  }
  func.func @transform_2(%arg0: i32) -> (i32, i32, i32, i32) {
    %c0_i32 = arith.constant 0 : i32
    %c0_i32_0 = arith.constant 0 : i32
    %c0_i32_1 = arith.constant 0 : i32
    %c0_i32_2 = arith.constant 0 : i32
    return %arg0, %c0_i32, %c0_i32_0, %c0_i32_1 : i32, i32, i32, i32
  }
  func.func @transform_3(%arg0: i32) -> (i32, i32, i32, i32) {
    %c0_i32 = arith.constant 0 : i32
    %c0_i32_0 = arith.constant 0 : i32
    %c0_i32_1 = arith.constant 0 : i32
    %c0_i32_2 = arith.constant 0 : i32
    return %arg0, %c0_i32, %c0_i32_0, %c0_i32_1 : i32, i32, i32, i32
  }
}

module attributes {stable_mosaic.version = 11 : i64} {
  func.func @_matmul_bias_kernel(%arg0: i32, %arg1: i32, %arg2: memref<16x32xf32, #tpu.memory_space<vmem>>, %arg3: memref<32x32xf32, #tpu.memory_space<vmem>>, %arg4: memref<1x32xf32, #tpu.memory_space<vmem>>, %arg5: memref<16x32xf32, #tpu.memory_space<vmem>>) attributes {dimension_semantics = [#tpu.dimension_semantics<parallel>, #tpu.dimension_semantics<parallel>], iteration_bounds = array<i64: 1, 1>, scalar_prefetch = 0 : i64, scratch_operands = 0 : i64, tpu.core_type = #tpu.core_type<tc>, window_params = [{transform_indices = @transform_0, window_bounds = array<i64: 16, 32>}, {transform_indices = @transform_1, window_bounds = array<i64: 32, 32>}, {transform_indices = @transform_2, window_bounds = array<i64: 1, 32>}, {transform_indices = @transform_3, window_bounds = array<i64: 16, 32>}]} {
    %c0 = arith.constant 0 : index
    %c0_0 = arith.constant 0 : index
    %0 = vector.load %arg2[%c0, %c0_0] : memref<16x32xf32, #tpu.memory_space<vmem>>, vector<16x32xf32>
    %c0_1 = arith.constant 0 : index
    %c0_2 = arith.constant 0 : index
    %1 = vector.load %arg3[%c0_1, %c0_2] : memref<32x32xf32, #tpu.memory_space<vmem>>, vector<32x32xf32>
    %cst = arith.constant dense<0.000000e+00> : vector<16x32xf32>
    %2 = tpu.matmul %0, %1, %cst {dimension_numbers = #tpu.dot_dimension_numbers<[1], [0], [0], [1], [0, 0, 1, 1], [], []>} : vector<16x32xf32>, vector<32x32xf32>, vector<16x32xf32> -> vector<16x32xf32>
    %c0_3 = arith.constant 0 : index
    %c0_4 = arith.constant 0 : index
    %3 = vector.load %arg4[%c0_3, %c0_4] : memref<1x32xf32, #tpu.memory_space<vmem>>, vector<1x32xf32>
    %4 = vector.broadcast %3 : vector<1x32xf32> to vector<16x32xf32>
    %5 = arith.addf %2, %4 : vector<16x32xf32>
    %c0_5 = arith.constant 0 : index
    %c0_6 = arith.constant 0 : index
    %6 = vector.load %arg5[%c0_5, %c0_6] : memref<16x32xf32, #tpu.memory_space<vmem>>, vector<16x32xf32>
    tpu.vector_store %arg5[%c0_5, %c0_6], %5 {strides = array<i32>} : memref<16x32xf32, #tpu.memory_space<vmem>>, vector<16x32xf32>,
    return
  }
  func.func @transform_0(%arg0: i32, %arg1: i32) -> (i32, i32) {
    %c0_i32 = arith.constant 0 : i32
    %c0_i32_0 = arith.constant 0 : i32
    return %arg0, %c0_i32 : i32, i32
  }
  func.func @transform_1(%arg0: i32, %arg1: i32) -> (i32, i32) {
    %c0_i32 = arith.constant 0 : i32
    %c0_i32_0 = arith.constant 0 : i32
    return %c0_i32, %arg1 : i32, i32
  }
  func.func @transform_2(%arg0: i32, %arg1: i32) -> (i32, i32) {
    %c0_i32 = arith.constant 0 : i32
    %c0_i32_0 = arith.constant 0 : i32
    return %c0_i32, %arg1 : i32, i32
  }
  func.func @transform_3(%arg0: i32, %arg1: i32) -> (i32, i32) {
    %c0_i32 = arith.constant 0 : i32
    return %arg0, %arg1 : i32, i32
  }
}

module attributes {stable_mosaic.version = 11 : i64} {
  func.func @_proj_add_ln_kernel(%arg0: i32, %arg1: memref<16x32xf32, #tpu.memory_space<vmem>>, %arg2: memref<32x32xf32, #tpu.memory_space<vmem>>, %arg3: memref<1x32xf32, #tpu.memory_space<vmem>>, %arg4: memref<16x32xf32, #tpu.memory_space<vmem>>, %arg5: memref<1x32xf32, #tpu.memory_space<vmem>>, %arg6: memref<1x32xf32, #tpu.memory_space<vmem>>, %arg7: memref<16x32xf32, #tpu.memory_space<vmem>>) attributes {dimension_semantics = [#tpu.dimension_semantics<parallel>], iteration_bounds = array<i64: 1>, scalar_prefetch = 0 : i64, scratch_operands = 0 : i64, tpu.core_type = #tpu.core_type<tc>, window_params = [{transform_indices = @transform_0, window_bounds = array<i64: 16, 32>}, {pipeline_mode = #tpu.pipeline_mode<synchronous>, transform_indices = @transform_1, window_bounds = array<i64: 32, 32>}, {pipeline_mode = #tpu.pipeline_mode<synchronous>, transform_indices = @transform_2, window_bounds = array<i64: 1, 32>}, {transform_indices = @transform_3, window_bounds = array<i64: 16, 32>}, {pipeline_mode = #tpu.pipeline_mode<synchronous>, transform_indices = @transform_4, window_bounds = array<i64: 1, 32>}, {pipeline_mode = #tpu.pipeline_mode<synchronous>, transform_indices = @transform_5, window_bounds = array<i64: 1, 32>}, {transform_indices = @transform_6, window_bounds = array<i64: 16, 32>}]} {
    %c0 = arith.constant 0 : index
    %c0_0 = arith.constant 0 : index
    %0 = vector.load %arg1[%c0, %c0_0] : memref<16x32xf32, #tpu.memory_space<vmem>>, vector<16x32xf32>
    %c0_1 = arith.constant 0 : index
    %c0_2 = arith.constant 0 : index
    %1 = vector.load %arg2[%c0_1, %c0_2] : memref<32x32xf32, #tpu.memory_space<vmem>>, vector<32x32xf32>
    %cst = arith.constant dense<0.000000e+00> : vector<16x32xf32>
    %2 = tpu.matmul %0, %1, %cst {dimension_numbers = #tpu.dot_dimension_numbers<[1], [0], [0], [1], [0, 0, 1, 1], [], []>} : vector<16x32xf32>, vector<32x32xf32>, vector<16x32xf32> -> vector<16x32xf32>
    %c0_3 = arith.constant 0 : index
    %c0_4 = arith.constant 0 : index
    %3 = vector.load %arg3[%c0_3, %c0_4] : memref<1x32xf32, #tpu.memory_space<vmem>>, vector<1x32xf32>
    %4 = vector.broadcast %3 : vector<1x32xf32> to vector<16x32xf32>
    %5 = arith.addf %2, %4 : vector<16x32xf32>
    %c0_5 = arith.constant 0 : index
    %c0_6 = arith.constant 0 : index
    %6 = vector.load %arg4[%c0_5, %c0_6] : memref<16x32xf32, #tpu.memory_space<vmem>>, vector<16x32xf32>
    %7 = arith.addf %6, %5 : vector<16x32xf32>
    %cst_7 = arith.constant dense<0.000000e+00> : vector<16xf32>
    %8 = vector.multi_reduction <add>, %7, %cst_7 [1] : vector<16x32xf32> to vector<16xf32>
    %9 = vector.shape_cast %8 : vector<16xf32> to vector<16x1xf32>
    %cst_8 = arith.constant 3.200000e+01 : f32
    %10 = vector.broadcast %cst_8 : f32 to vector<16x1xf32>
    %11 = arith.divf %9, %10 : vector<16x1xf32>
    %12 = vector.broadcast %11 : vector<16x1xf32> to vector<16x32xf32>
    %13 = arith.subf %7, %12 : vector<16x32xf32>
    %14 = arith.mulf %13, %13 : vector<16x32xf32>
    %cst_9 = arith.constant dense<0.000000e+00> : vector<16xf32>
    %15 = vector.multi_reduction <add>, %14, %cst_9 [1] : vector<16x32xf32> to vector<16xf32>
    %16 = vector.shape_cast %15 : vector<16xf32> to vector<16x1xf32>
    %cst_10 = arith.constant 3.200000e+01 : f32
    %17 = vector.broadcast %cst_10 : f32 to vector<16x1xf32>
    %18 = arith.divf %16, %17 : vector<16x1xf32>
    %cst_11 = arith.constant 9.99999974E-6 : f32
    %19 = vector.broadcast %cst_11 : f32 to vector<16x1xf32>
    %20 = arith.addf %18, %19 : vector<16x1xf32>
    %21 = math.rsqrt %20 : vector<16x1xf32>
    %22 = vector.broadcast %21 : vector<16x1xf32> to vector<16x32xf32>
    %23 = arith.mulf %13, %22 : vector<16x32xf32>
    %c0_12 = arith.constant 0 : index
    %c0_13 = arith.constant 0 : index
    %24 = vector.load %arg5[%c0_12, %c0_13] : memref<1x32xf32, #tpu.memory_space<vmem>>, vector<1x32xf32>
    %25 = vector.broadcast %24 : vector<1x32xf32> to vector<16x32xf32>
    %26 = arith.mulf %23, %25 : vector<16x32xf32>
    %c0_14 = arith.constant 0 : index
    %c0_15 = arith.constant 0 : index
    %27 = vector.load %arg6[%c0_14, %c0_15] : memref<1x32xf32, #tpu.memory_space<vmem>>, vector<1x32xf32>
    %28 = vector.broadcast %27 : vector<1x32xf32> to vector<16x32xf32>
    %29 = arith.addf %26, %28 : vector<16x32xf32>
    %c0_16 = arith.constant 0 : index
    %c0_17 = arith.constant 0 : index
    %30 = vector.load %arg7[%c0_16, %c0_17] : memref<16x32xf32, #tpu.memory_space<vmem>>, vector<16x32xf32>
    tpu.vector_store %arg7[%c0_16, %c0_17], %29 {strides = array<i32>} : memref<16x32xf32, #tpu.memory_space<vmem>>, vector<16x32xf32>,
    return
  }
  func.func @transform_0(%arg0: i32) -> (i32, i32) {
    %c0_i32 = arith.constant 0 : i32
    %c0_i32_0 = arith.constant 0 : i32
    return %arg0, %c0_i32 : i32, i32
  }
  func.func @transform_1(%arg0: i32) -> (i32, i32) {
    %c0_i32 = arith.constant 0 : i32
    %c0_i32_0 = arith.constant 0 : i32
    %c0_i32_1 = arith.constant 0 : i32
    return %c0_i32, %c0_i32_0 : i32, i32
  }
  func.func @transform_2(%arg0: i32) -> (i32, i32) {
    %c0_i32 = arith.constant 0 : i32
    %c0_i32_0 = arith.constant 0 : i32
    %c0_i32_1 = arith.constant 0 : i32
    return %c0_i32, %c0_i32_0 : i32, i32
  }
  func.func @transform_3(%arg0: i32) -> (i32, i32) {
    %c0_i32 = arith.constant 0 : i32
    %c0_i32_0 = arith.constant 0 : i32
    return %arg0, %c0_i32 : i32, i32
  }
  func.func @transform_4(%arg0: i32) -> (i32, i32) {
    %c0_i32 = arith.constant 0 : i32
    %c0_i32_0 = arith.constant 0 : i32
    %c0_i32_1 = arith.constant 0 : i32
    return %c0_i32, %c0_i32_0 : i32, i32
  }
  func.func @transform_5(%arg0: i32) -> (i32, i32) {
    %c0_i32 = arith.constant 0 : i32
    %c0_i32_0 = arith.constant 0 : i32
    %c0_i32_1 = arith.constant 0 : i32
    return %c0_i32, %c0_i32_0 : i32, i32
  }
  func.func @transform_6(%arg0: i32) -> (i32, i32) {
    %c0_i32 = arith.constant 0 : i32
    %c0_i32_0 = arith.constant 0 : i32
    return %arg0, %c0_i32 : i32, i32
  }
}

module attributes {stable_mosaic.version = 11 : i64} {
  func.func @_matmul_bias_kernel(%arg0: i32, %arg1: i32, %arg2: memref<16x32xf32, #tpu.memory_space<vmem>>, %arg3: memref<32x64xf32, #tpu.memory_space<vmem>>, %arg4: memref<1x64xf32, #tpu.memory_space<vmem>>, %arg5: memref<16x64xf32, #tpu.memory_space<vmem>>) attributes {dimension_semantics = [#tpu.dimension_semantics<parallel>, #tpu.dimension_semantics<parallel>], iteration_bounds = array<i64: 1, 1>, scalar_prefetch = 0 : i64, scratch_operands = 0 : i64, tpu.core_type = #tpu.core_type<tc>, window_params = [{transform_indices = @transform_0, window_bounds = array<i64: 16, 32>}, {transform_indices = @transform_1, window_bounds = array<i64: 32, 64>}, {transform_indices = @transform_2, window_bounds = array<i64: 1, 64>}, {transform_indices = @transform_3, window_bounds = array<i64: 16, 64>}]} {
    %c0 = arith.constant 0 : index
    %c0_0 = arith.constant 0 : index
    %0 = vector.load %arg2[%c0, %c0_0] : memref<16x32xf32, #tpu.memory_space<vmem>>, vector<16x32xf32>
    %c0_1 = arith.constant 0 : index
    %c0_2 = arith.constant 0 : index
    %1 = vector.load %arg3[%c0_1, %c0_2] : memref<32x64xf32, #tpu.memory_space<vmem>>, vector<32x64xf32>
    %cst = arith.constant dense<0.000000e+00> : vector<16x64xf32>
    %2 = tpu.matmul %0, %1, %cst {dimension_numbers = #tpu.dot_dimension_numbers<[1], [0], [0], [1], [0, 0, 1, 1], [], []>} : vector<16x32xf32>, vector<32x64xf32>, vector<16x64xf32> -> vector<16x64xf32>
    %c0_3 = arith.constant 0 : index
    %c0_4 = arith.constant 0 : index
    %3 = vector.load %arg4[%c0_3, %c0_4] : memref<1x64xf32, #tpu.memory_space<vmem>>, vector<1x64xf32>
    %4 = vector.broadcast %3 : vector<1x64xf32> to vector<16x64xf32>
    %5 = arith.addf %2, %4 : vector<16x64xf32>
    %c0_5 = arith.constant 0 : index
    %c0_6 = arith.constant 0 : index
    %6 = vector.load %arg5[%c0_5, %c0_6] : memref<16x64xf32, #tpu.memory_space<vmem>>, vector<16x64xf32>
    tpu.vector_store %arg5[%c0_5, %c0_6], %5 {strides = array<i32>} : memref<16x64xf32, #tpu.memory_space<vmem>>, vector<16x64xf32>,
    return
  }
  func.func @transform_0(%arg0: i32, %arg1: i32) -> (i32, i32) {
    %c0_i32 = arith.constant 0 : i32
    %c0_i32_0 = arith.constant 0 : i32
    return %arg0, %c0_i32 : i32, i32
  }
  func.func @transform_1(%arg0: i32, %arg1: i32) -> (i32, i32) {
    %c0_i32 = arith.constant 0 : i32
    %c0_i32_0 = arith.constant 0 : i32
    return %c0_i32, %arg1 : i32, i32
  }
  func.func @transform_2(%arg0: i32, %arg1: i32) -> (i32, i32) {
    %c0_i32 = arith.constant 0 : i32
    %c0_i32_0 = arith.constant 0 : i32
    return %c0_i32, %arg1 : i32, i32
  }
  func.func @transform_3(%arg0: i32, %arg1: i32) -> (i32, i32) {
    %c0_i32 = arith.constant 0 : i32
    return %arg0, %arg1 : i32, i32
  }
}

module attributes {stable_mosaic.version = 11 : i64} {
  func.func @_attn_kernel_with_probs(%arg0: i32, %arg1: memref<1x4x8x8xf32, #tpu.memory_space<vmem>>, %arg2: memref<1x4x8x8xf32, #tpu.memory_space<vmem>>, %arg3: memref<1x4x8x8xf32, #tpu.memory_space<vmem>>, %arg4: memref<1x4x8x8xf32, #tpu.memory_space<vmem>>, %arg5: memref<1x4x8x8xf32, #tpu.memory_space<vmem>>) attributes {dimension_semantics = [#tpu.dimension_semantics<parallel>], iteration_bounds = array<i64: 2>, scalar_prefetch = 0 : i64, scratch_operands = 0 : i64, tpu.core_type = #tpu.core_type<tc>, window_params = [{transform_indices = @transform_0, window_bounds = array<i64: 1, 4, 8, 8>}, {transform_indices = @transform_1, window_bounds = array<i64: 1, 4, 8, 8>}, {transform_indices = @transform_2, window_bounds = array<i64: 1, 4, 8, 8>}, {transform_indices = @transform_3, window_bounds = array<i64: 1, 4, 8, 8>}, {transform_indices = @transform_4, window_bounds = array<i64: 1, 4, 8, 8>}]} {
    %c0 = arith.constant 0 : index
    %c0_0 = arith.constant 0 : index
    %c0_1 = arith.constant 0 : index
    %c0_2 = arith.constant 0 : index
    %0 = vector.load %arg1[%c0, %c0_0, %c0_1, %c0_2] : memref<1x4x8x8xf32, #tpu.memory_space<vmem>>, vector<1x4x8x8xf32>
    %1 = vector.shape_cast %0 : vector<1x4x8x8xf32> to vector<4x8x8xf32>
    %c0_3 = arith.constant 0 : index
    %c0_4 = arith.constant 0 : index
    %c0_5 = arith.constant 0 : index
    %c0_6 = arith.constant 0 : index
    %2 = vector.load %arg2[%c0_3, %c0_4, %c0_5, %c0_6] : memref<1x4x8x8xf32, #tpu.memory_space<vmem>>, vector<1x4x8x8xf32>
    %3 = vector.shape_cast %2 : vector<1x4x8x8xf32> to vector<4x8x8xf32>
    %c0_7 = arith.constant 0 : index
    %c0_8 = arith.constant 0 : index
    %c0_9 = arith.constant 0 : index
    %c0_10 = arith.constant 0 : index
    %4 = vector.load %arg3[%c0_7, %c0_8, %c0_9, %c0_10] : memref<1x4x8x8xf32, #tpu.memory_space<vmem>>, vector<1x4x8x8xf32>
    %5 = vector.shape_cast %4 : vector<1x4x8x8xf32> to vector<4x8x8xf32>
    "tpu.trace_start"() <{level = 10 : i32, message = "hqd,hkd->hqk"}> : () -> ()
    %cst = arith.constant dense<0.000000e+00> : vector<4x8x8xf32>
    %6 = tpu.matmul %1, %3, %cst {dimension_numbers = #tpu.dot_dimension_numbers<[2], [2], [1], [1], [0, 0, 0, 1, 1, 1], [0], [0]>} : vector<4x8x8xf32>, vector<4x8x8xf32>, vector<4x8x8xf32> -> vector<4x8x8xf32>
    "tpu.trace_stop"() : () -> ()
    %cst_11 = arith.constant 0.353553385 : f32
    %7 = vector.broadcast %cst_11 : f32 to vector<4x8x8xf32>
    %8 = arith.mulf %6, %7 : vector<4x8x8xf32>
    %cst_12 = arith.constant dense<0xFF800000> : vector<4x8xf32>
    %9 = vector.multi_reduction <maximumf>, %8, %cst_12 [2] : vector<4x8x8xf32> to vector<4x8xf32>
    %10 = vector.shape_cast %9 : vector<4x8xf32> to vector<4x8x1xf32>
    %11 = vector.broadcast %10 : vector<4x8x1xf32> to vector<4x8x8xf32>
    %12 = arith.subf %8, %11 : vector<4x8x8xf32>
    %13 = math.exp %12 : vector<4x8x8xf32>
    %cst_13 = arith.constant dense<0.000000e+00> : vector<4x8xf32>
    %14 = vector.multi_reduction <add>, %13, %cst_13 [2] : vector<4x8x8xf32> to vector<4x8xf32>
    %15 = vector.shape_cast %14 : vector<4x8xf32> to vector<4x8x1xf32>
    %16 = tpu.reciprocal %15 {approx = true} : vector<4x8x1xf32> -> vector<4x8x1xf32>
    %17 = vector.broadcast %16 : vector<4x8x1xf32> to vector<4x8x8xf32>
    %18 = arith.mulf %13, %17 : vector<4x8x8xf32>
    "tpu.trace_start"() <{level = 10 : i32, message = "hqk,hkd->hqd"}> : () -> ()
    %cst_14 = arith.constant dense<0.000000e+00> : vector<4x8x8xf32>
    %19 = tpu.matmul %18, %5, %cst_14 {dimension_numbers = #tpu.dot_dimension_numbers<[2], [1], [1], [2], [0, 0, 0, 1, 1, 2], [0], [0]>} : vector<4x8x8xf32>, vector<4x8x8xf32>, vector<4x8x8xf32> -> vector<4x8x8xf32>
    "tpu.trace_stop"() : () -> ()
    %c0_15 = arith.constant 0 : index
    %c0_16 = arith.constant 0 : index
    %c0_17 = arith.constant 0 : index
    %c0_18 = arith.constant 0 : index
    %20 = vector.load %arg5[%c0_15, %c0_16, %c0_17, %c0_18] : memref<1x4x8x8xf32, #tpu.memory_space<vmem>>, vector<1x4x8x8xf32>
    %21 = vector.shape_cast %20 : vector<1x4x8x8xf32> to vector<4x8x8xf32>
    %22 = vector.shape_cast %18 : vector<4x8x8xf32> to vector<1x4x8x8xf32>
    tpu.vector_store %arg5[%c0_15, %c0_16, %c0_17, %c0_18], %22 {strides = array<i32>} : memref<1x4x8x8xf32, #tpu.memory_space<vmem>>, vector<1x4x8x8xf32>,
    %c0_19 = arith.constant 0 : index
    %c0_20 = arith.constant 0 : index
    %c0_21 = arith.constant 0 : index
    %c0_22 = arith.constant 0 : index
    %23 = vector.load %arg4[%c0_19, %c0_20, %c0_21, %c0_22] : memref<1x4x8x8xf32, #tpu.memory_space<vmem>>, vector<1x4x8x8xf32>
    %24 = vector.shape_cast %23 : vector<1x4x8x8xf32> to vector<4x8x8xf32>
    %25 = vector.shape_cast %19 : vector<4x8x8xf32> to vector<1x4x8x8xf32>
    tpu.vector_store %arg4[%c0_19, %c0_20, %c0_21, %c0_22], %25 {strides = array<i32>} : memref<1x4x8x8xf32, #tpu.memory_space<vmem>>, vector<1x4x8x8xf32>,
    return
  }
  func.func @transform_0(%arg0: i32) -> (i32, i32, i32, i32) {
    %c0_i32 = arith.constant 0 : i32
    %c0_i32_0 = arith.constant 0 : i32
    %c0_i32_1 = arith.constant 0 : i32
    %c0_i32_2 = arith.constant 0 : i32
    return %arg0, %c0_i32, %c0_i32_0, %c0_i32_1 : i32, i32, i32, i32
  }
  func.func @transform_1(%arg0: i32) -> (i32, i32, i32, i32) {
    %c0_i32 = arith.constant 0 : i32
    %c0_i32_0 = arith.constant 0 : i32
    %c0_i32_1 = arith.constant 0 : i32
    %c0_i32_2 = arith.constant 0 : i32
    return %arg0, %c0_i32, %c0_i32_0, %c0_i32_1 : i32, i32, i32, i32
  }
  func.func @transform_2(%arg0: i32) -> (i32, i32, i32, i32) {
    %c0_i32 = arith.constant 0 : i32
    %c0_i32_0 = arith.constant 0 : i32
    %c0_i32_1 = arith.constant 0 : i32
    %c0_i32_2 = arith.constant 0 : i32
    return %arg0, %c0_i32, %c0_i32_0, %c0_i32_1 : i32, i32, i32, i32
  }
  func.func @transform_3(%arg0: i32) -> (i32, i32, i32, i32) {
    %c0_i32 = arith.constant 0 : i32
    %c0_i32_0 = arith.constant 0 : i32
    %c0_i32_1 = arith.constant 0 : i32
    %c0_i32_2 = arith.constant 0 : i32
    return %arg0, %c0_i32, %c0_i32_0, %c0_i32_1 : i32, i32, i32, i32
  }
  func.func @transform_4(%arg0: i32) -> (i32, i32, i32, i32) {
    %c0_i32 = arith.constant 0 : i32
    %c0_i32_0 = arith.constant 0 : i32
    %c0_i32_1 = arith.constant 0 : i32
    %c0_i32_2 = arith.constant 0 : i32
    return %arg0, %c0_i32, %c0_i32_0, %c0_i32_1 : i32, i32, i32, i32
  }
}

module attributes {stable_mosaic.version = 11 : i64} {
  func.func @_ffn_add_ln_kernel(%arg0: i32, %arg1: i32, %arg2: memref<16x32xf32, #tpu.memory_space<vmem>>, %arg3: memref<32x64xf32, #tpu.memory_space<vmem>>, %arg4: memref<1x64xf32, #tpu.memory_space<vmem>>, %arg5: memref<64x32xf32, #tpu.memory_space<vmem>>, %arg6: memref<1x32xf32, #tpu.memory_space<vmem>>, %arg7: memref<1x32xf32, #tpu.memory_space<vmem>>, %arg8: memref<1x32xf32, #tpu.memory_space<vmem>>, %arg9: memref<16x32xf32, #tpu.memory_space<vmem>>, %arg10: memref<16x32xf32, #tpu.memory_space<vmem>>) attributes {dimension_semantics = [#tpu.dimension_semantics<parallel>, #tpu.dimension_semantics<arbitrary>], iteration_bounds = array<i64: 1, 1>, scalar_prefetch = 0 : i64, scratch_operands = 1 : i64, tpu.core_type = #tpu.core_type<tc>, window_params = [{transform_indices = @transform_0, window_bounds = array<i64: 16, 32>}, {transform_indices = @transform_1, window_bounds = array<i64: 32, 64>}, {transform_indices = @transform_2, window_bounds = array<i64: 1, 64>}, {transform_indices = @transform_3, window_bounds = array<i64: 64, 32>}, {pipeline_mode = #tpu.pipeline_mode<synchronous>, transform_indices = @transform_4, window_bounds = array<i64: 1, 32>}, {pipeline_mode = #tpu.pipeline_mode<synchronous>, transform_indices = @transform_5, window_bounds = array<i64: 1, 32>}, {pipeline_mode = #tpu.pipeline_mode<synchronous>, transform_indices = @transform_6, window_bounds = array<i64: 1, 32>}, {transform_indices = @transform_7, window_bounds = array<i64: 16, 32>}]} {
    %c0_i32 = arith.constant 0 : i32
    %0 = arith.cmpi eq, %arg1, %c0_i32 : i32
    %1 = arith.extui %0 : i1 to i32
    %c0_i32_0 = arith.constant 0 : i32
    %2 = arith.cmpi ne, %1, %c0_i32_0 : i32
    scf.if %2 {
      %cst_16 = arith.constant 0.000000e+00 : f32
      %19 = vector.broadcast %cst_16 : f32 to vector<16x32xf32>
      %c0_17 = arith.constant 0 : index
      %c0_18 = arith.constant 0 : index
      %20 = vector.load %arg10[%c0_17, %c0_18] : memref<16x32xf32, #tpu.memory_space<vmem>>, vector<16x32xf32>
      tpu.vector_store %arg10[%c0_17, %c0_18], %19 {strides = array<i32>} : memref<16x32xf32, #tpu.memory_space<vmem>>, vector<16x32xf32>,
    } else {
    }
    %c0 = arith.constant 0 : index
    %c0_1 = arith.constant 0 : index
    %3 = vector.load %arg2[%c0, %c0_1] : memref<16x32xf32, #tpu.memory_space<vmem>>, vector<16x32xf32>
    %c0_2 = arith.constant 0 : index
    %c0_3 = arith.constant 0 : index
    %4 = vector.load %arg3[%c0_2, %c0_3] : memref<32x64xf32, #tpu.memory_space<vmem>>, vector<32x64xf32>
    %cst = arith.constant dense<0.000000e+00> : vector<16x64xf32>
    %5 = tpu.matmul %3, %4, %cst {dimension_numbers = #tpu.dot_dimension_numbers<[1], [0], [0], [1], [0, 0, 1, 1], [], []>} : vector<16x32xf32>, vector<32x64xf32>, vector<16x64xf32> -> vector<16x64xf32>
    %c0_4 = arith.constant 0 : index
    %c0_5 = arith.constant 0 : index
    %6 = vector.load %arg4[%c0_4, %c0_5] : memref<1x64xf32, #tpu.memory_space<vmem>>, vector<1x64xf32>
    %7 = vector.broadcast %6 : vector<1x64xf32> to vector<16x64xf32>
    %8 = arith.addf %5, %7 : vector<16x64xf32>
    %cst_6 = arith.constant 0.000000e+00 : f32
    %9 = vector.broadcast %cst_6 : f32 to vector<16x64xf32>
    %10 = arith.maximumf %8, %9 : vector<16x64xf32>
    %c0_7 = arith.constant 0 : index
    %c0_8 = arith.constant 0 : index
    %11 = vector.load %arg10[%c0_7, %c0_8] : memref<16x32xf32, #tpu.memory_space<vmem>>, vector<16x32xf32>
    %c0_9 = arith.constant 0 : index
    %c0_10 = arith.constant 0 : index
    %12 = vector.load %arg5[%c0_9, %c0_10] : memref<64x32xf32, #tpu.memory_space<vmem>>, vector<64x32xf32>
    %cst_11 = arith.constant dense<0.000000e+00> : vector<16x32xf32>
    %13 = tpu.matmul %10, %12, %cst_11 {dimension_numbers = #tpu.dot_dimension_numbers<[1], [0], [0], [1], [0, 0, 1, 1], [], []>} : vector<16x64xf32>, vector<64x32xf32>, vector<16x32xf32> -> vector<16x32xf32>
    %14 = arith.addf %11, %13 : vector<16x32xf32>
    %c0_12 = arith.constant 0 : index
    %c0_13 = arith.constant 0 : index
    %15 = vector.load %arg10[%c0_12, %c0_13] : memref<16x32xf32, #tpu.memory_space<vmem>>, vector<16x32xf32>
    tpu.vector_store %arg10[%c0_12, %c0_13], %14 {strides = array<i32>} : memref<16x32xf32, #tpu.memory_space<vmem>>, vector<16x32xf32>,
    %c0_i32_14 = arith.constant 0 : i32
    %16 = arith.cmpi eq, %arg1, %c0_i32_14 : i32
    %17 = arith.extui %16 : i1 to i32
    %c0_i32_15 = arith.constant 0 : i32
    %18 = arith.cmpi ne, %17, %c0_i32_15 : i32
    scf.if %18 {
      %c0_16 = arith.constant 0 : index
      %c0_17 = arith.constant 0 : index
      %19 = vector.load %arg2[%c0_16, %c0_17] : memref<16x32xf32, #tpu.memory_space<vmem>>, vector<16x32xf32>
      %c0_18 = arith.constant 0 : index
      %c0_19 = arith.constant 0 : index
      %20 = vector.load %arg10[%c0_18, %c0_19] : memref<16x32xf32, #tpu.memory_space<vmem>>, vector<16x32xf32>
      %21 = arith.addf %19, %20 : vector<16x32xf32>
      %c0_20 = arith.constant 0 : index
      %c0_21 = arith.constant 0 : index
      %22 = vector.load %arg6[%c0_20, %c0_21] : memref<1x32xf32, #tpu.memory_space<vmem>>, vector<1x32xf32>
      %23 = vector.broadcast %22 : vector<1x32xf32> to vector<16x32xf32>
      %24 = arith.addf %21, %23 : vector<16x32xf32>
      %cst_22 = arith.constant dense<0.000000e+00> : vector<16xf32>
      %25 = vector.multi_reduction <add>, %24, %cst_22 [1] : vector<16x32xf32> to vector<16xf32>
      %26 = vector.shape_cast %25 : vector<16xf32> to vector<16x1xf32>
      %cst_23 = arith.constant 3.200000e+01 : f32
      %27 = vector.broadcast %cst_23 : f32 to vector<16x1xf32>
      %28 = arith.divf %26, %27 : vector<16x1xf32>
      %29 = vector.broadcast %28 : vector<16x1xf32> to vector<16x32xf32>
      %30 = arith.subf %24, %29 : vector<16x32xf32>
      %31 = arith.mulf %30, %30 : vector<16x32xf32>
      %cst_24 = arith.constant dense<0.000000e+00> : vector<16xf32>
      %32 = vector.multi_reduction <add>, %31, %cst_24 [1] : vector<16x32xf32> to vector<16xf32>
      %33 = vector.shape_cast %32 : vector<16xf32> to vector<16x1xf32>
      %cst_25 = arith.constant 3.200000e+01 : f32
      %34 = vector.broadcast %cst_25 : f32 to vector<16x1xf32>
      %35 = arith.divf %33, %34 : vector<16x1xf32>
      %cst_26 = arith.constant 9.99999974E-6 : f32
      %36 = vector.broadcast %cst_26 : f32 to vector<16x1xf32>
      %37 = arith.addf %35, %36 : vector<16x1xf32>
      %38 = math.rsqrt %37 : vector<16x1xf32>
      %39 = vector.broadcast %38 : vector<16x1xf32> to vector<16x32xf32>
      %40 = arith.mulf %30, %39 : vector<16x32xf32>
      %c0_27 = arith.constant 0 : index
      %c0_28 = arith.constant 0 : index
      %41 = vector.load %arg7[%c0_27, %c0_28] : memref<1x32xf32, #tpu.memory_space<vmem>>, vector<1x32xf32>
      %42 = vector.broadcast %41 : vector<1x32xf32> to vector<16x32xf32>
      %43 = arith.mulf %40, %42 : vector<16x32xf32>
      %c0_29 = arith.constant 0 : index
      %c0_30 = arith.constant 0 : index
      %44 = vector.load %arg8[%c0_29, %c0_30] : memref<1x32xf32, #tpu.memory_space<vmem>>, vector<1x32xf32>
      %45 = vector.broadcast %44 : vector<1x32xf32> to vector<16x32xf32>
      %46 = arith.addf %43, %45 : vector<16x32xf32>
      %c0_31 = arith.constant 0 : index
      %c0_32 = arith.constant 0 : index
      %47 = vector.load %arg9[%c0_31, %c0_32] : memref<16x32xf32, #tpu.memory_space<vmem>>, vector<16x32xf32>
      tpu.vector_store %arg9[%c0_31, %c0_32], %46 {strides = array<i32>} : memref<16x32xf32, #tpu.memory_space<vmem>>, vector<16x32xf32>,
    } else {
    }
    return
  }
  func.func @transform_0(%arg0: i32, %arg1: i32) -> (i32, i32) {
    %c0_i32 = arith.constant 0 : i32
    %c0_i32_0 = arith.constant 0 : i32
    return %arg0, %c0_i32 : i32, i32
  }
  func.func @transform_1(%arg0: i32, %arg1: i32) -> (i32, i32) {
    %c0_i32 = arith.constant 0 : i32
    %c0_i32_0 = arith.constant 0 : i32
    return %c0_i32, %arg1 : i32, i32
  }
  func.func @transform_2(%arg0: i32, %arg1: i32) -> (i32, i32) {
    %c0_i32 = arith.constant 0 : i32
    %c0_i32_0 = arith.constant 0 : i32
    return %c0_i32, %arg1 : i32, i32
  }
  func.func @transform_3(%arg0: i32, %arg1: i32) -> (i32, i32) {
    %c0_i32 = arith.constant 0 : i32
    %c0_i32_0 = arith.constant 0 : i32
    return %arg1, %c0_i32 : i32, i32
  }
  func.func @transform_4(%arg0: i32, %arg1: i32) -> (i32, i32) {
    %c0_i32 = arith.constant 0 : i32
    %c0_i32_0 = arith.constant 0 : i32
    %c0_i32_1 = arith.constant 0 : i32
    return %c0_i32, %c0_i32_0 : i32, i32
  }
  func.func @transform_5(%arg0: i32, %arg1: i32) -> (i32, i32) {
    %c0_i32 = arith.constant 0 : i32
    %c0_i32_0 = arith.constant 0 : i32
    %c0_i32_1 = arith.constant 0 : i32
    return %c0_i32, %c0_i32_0 : i32, i32
  }
  func.func @transform_6(%arg0: i32, %arg1: i32) -> (i32, i32) {
    %c0_i32 = arith.constant 0 : i32
    %c0_i32_0 = arith.constant 0 : i32
    %c0_i32_1 = arith.constant 0 : i32
    return %c0_i32, %c0_i32_0 : i32, i32
  }
  func.func @transform_7(%arg0: i32, %arg1: i32) -> (i32, i32) {
    %c0_i32 = arith.constant 0 : i32
    %c0_i32_0 = arith.constant 0 : i32
    return %arg0, %c0_i32 : i32, i32
  }
}

</mosaic_0001>

<bundles_post_ra>
// kernel: decoder_layer.8
= control target key start
LH: loop header
LB: loop body
LE: loop exit
PB: predicated region body
PF: predicated region fallthrough
CT: control target
= control target key end

     0   :  { %vm27_vm0 = vcmask 261120   ;;  %vm109_vm1 = vcmask 785408   ;;  %s185_s1 = inlined_call_operand.vmem [shape: f32[32,96], index: 1, kind: input, shape index: {}]   ;;  %s186_s0 = inlined_call_operand.vmem [shape: f32[16,32], index: 0, kind: input, shape index: {}]   ;;  %s187_s2 = inlined_call_operand.vmem [shape: f32[1,96], index: 2, kind: input, shape index: {}]   ;;  %s188_s3 = inlined_call_operand.vmem [shape: f32[16,96], index: 3, kind: output, shape index: {}]  }
   0x1   :  { %v19_v0 = vld [vmem:[%s185_s1 + $0x18] sm:$0xff]  ;;  %v18_v1 = vld [vmem:[%s185_s1 + $0x10] sm:$0xff]  ;;  %v14_v2 = vld [vmem:[%s186_s0] sm:$0xff] }
   0x2   :  { %125 = vmatprep.subr.mxu0 %v19_v0  ;;  %v17_v3 = vld [vmem:[%s185_s1 + $0x8] sm:$0xff]  ;;  %133 = vmatprep.mubr.msk.f32.mxu0 %vm27_vm0, %v14_v2  ;;  %v16_v4 = vld [vmem:[%s185_s1] sm:$0xff] }
   0x3   :  { %126 = vmatpush3.msra.mxu0 %v19_v0  ;;  %v15_v5 = vld [vmem:[%s186_s0 + $0x8] sm:$0xff]  ;;  %v116_v6 = vld [vmem:[%s187_s2] ss:$0 sm:$0xff] }
   0x4   :  { %127 = vmatprep.subr.mxu0 %v18_v1 }
   0x5   :  { %128 = vmatpush3.msra.mxu0 %v18_v1 }
   0x6   :  { %129 = vmatprep.subr.mxu0 %v17_v3 }
   0x7   :  { %130 = vmatpush3.msra.mxu0 %v17_v3 }
   0x8   :  { %131 = vmatprep.subr.mxu0 %v16_v4 }
   0x9   :  { %132 = vmatpush3.msra.mxu0 %v16_v4 }
   0xa   :  { %134 = vmatmul.mubr.msk.f32.vlgmr.msra.gmra.mxu0 %vm27_vm0, %v15_v5 }
  0xca   :  { %v135_v7 = vpop.f32.mrf.mxu0 }
  0xcb   :  { %v106_v8 = vadd.f32 %v135_v7, %v116_v6 }
  0xcc   :  { %v100_v9 = vpop.f32.mrf.mxu0 }
  0xcd   :  { %111 = vst.msk [vmem:[%s188_s3 + $0x8] sm:$0xff] %vm109_vm1, %v106_v8  ;;  %v101_v10 = vadd.f32 %v116_v6, %v100_v9 }
  0xcf   :  { %110 = vst.msk [vmem:[%s188_s3] sm:$0xff] %vm109_vm1, %v101_v10 }

// kernel: decoder_layer.11
= control target key start
LH: loop header
LB: loop body
LE: loop exit
PB: predicated region body
PF: predicated region fallthrough
CT: control target
= control target key end

     0   :  { %vm27_vm0 = vcmask 261120   ;;  %s186_s1 = inlined_call_operand.vmem [shape: f32[32,32], index: 1, kind: input, shape index: {}]   ;;  %s187_s0 = inlined_call_operand.vmem [shape: f32[16,32], index: 0, kind: input, shape index: {}]   ;;  %s188_s2 = inlined_call_operand.vmem [shape: f32[1,32], index: 2, kind: input, shape index: {}]   ;;  %s189_s3 = inlined_call_operand.vmem [shape: f32[16,32], index: 3, kind: output, shape index: {}]  }
   0x1   :  { %v19_v0 = vld [vmem:[%s186_s1 + $0x18] sm:$0xff]  ;;  %v18_v1 = vld [vmem:[%s186_s1 + $0x10] sm:$0xff]  ;;  %v14_v2 = vld [vmem:[%s187_s0] sm:$0xff] }
   0x2   :  { %124 = vmatprep.subr.mxu0 %v19_v0  ;;  %v17_v3 = vld [vmem:[%s186_s1 + $0x8] sm:$0xff]  ;;  %132 = vmatprep.mubr.msk.f32.mxu0 %vm27_vm0, %v14_v2  ;;  %v16_v4 = vld [vmem:[%s186_s1] sm:$0xff] }
   0x3   :  { %125 = vmatpush3.msra.mxu0 %v19_v0  ;;  %v15_v5 = vld [vmem:[%s187_s0 + $0x8] sm:$0xff]  ;;  %v115_v6 = vld [vmem:[%s188_s2] ss:$0 sm:$0xff] }
   0x4   :  { %126 = vmatprep.subr.mxu0 %v18_v1 }
   0x5   :  { %127 = vmatpush3.msra.mxu0 %v18_v1 }
   0x6   :  { %128 = vmatprep.subr.mxu0 %v17_v3 }
   0x7   :  { %129 = vmatpush3.msra.mxu0 %v17_v3 }
   0x8   :  { %130 = vmatprep.subr.mxu0 %v16_v4 }
   0x9   :  { %131 = vmatpush3.msra.mxu0 %v16_v4 }
   0xa   :  { %133 = vmatmul.mubr.msk.f32.vlgmr.msra.gmra.mxu0 %vm27_vm0, %v15_v5 }
  0xca   :  { %v134_v7 = vpop.f32.mrf.mxu0 }
  0xcb   :  { %v106_v8 = vadd.f32 %v134_v7, %v115_v6 }
  0xcc   :  { %v100_v9 = vpop.f32.mrf.mxu0 }
  0xcd   :  { %110 = vst.msk [vmem:[%s189_s3 + $0x8] sm:$0xff] %vm27_vm0, %v106_v8  ;;  %v101_v10 = vadd.f32 %v115_v6, %v100_v9 }
  0xcf   :  { %109 = vst.msk [vmem:[%s189_s3] sm:$0xff] %vm27_vm0, %v101_v10 }

// kernel: decoder_layer.9
= control target key start
LH: loop header
LB: loop body
LE: loop exit
PB: predicated region body
PF: predicated region fallthrough
CT: control target
= control target key end

     0   :  { %s1094_s12 = smov 0   ;;  %s1171_s0 = inlined_call_operand.vmem [shape: f32[2,4,8,8], index: 0, kind: input, shape index: {}]   ;;  %s1172_s1 = inlined_call_operand.vmem [shape: f32[2,4,8,8], index: 1, kind: input, shape index: {}]   ;;  %s1173_s2 = inlined_call_operand.vmem [shape: f32[2,4,8,8], index: 2, kind: input, shape index: {}]   ;;  %s1174_s3 = inlined_call_operand.vmem [shape: f32[2,4,8,8], index: 3, kind: output, shape index: {}]  }
   0x1 LB: > { %s951_s13 = sadd.s32 4294967295, %s1070_s12   ;;  %p955_p0 = scmp.ge.s32.totalorder %s1070_s12, 1  ;;  %s1070_s12 = sphi %s1094_s12, %s13_s12  }
   0x2   : > { %p157_p1 = scmp.lt.s32.totalorder %s1070_s12, 3 }
   0x4   : > { %p158_p2 = pnand %p955_p0, %p157_p1 }
   0x5   : > { %p191_p3 = scmp.lt.s32.totalorder (!%p158_p2), %s951_s13, 1 }
   0x6   : > { %161 = sbr.rel (%p158_p2) target bundleno = 728 (0x2d8), region = 32 }
   0xb   : > { %v1072_v0 = vmov 0.0   ;;  %vm1073_vm0 = vmmov 0   ;;  %s1176_s13 = smov (!%p191_p3, %s951_s13), 1  ;;  %vm223_vm1 = vcmask 64512  }
   0xc   : > { %998 = vmatprep.subr.mxu0 %v1072_v0  ;;  %1000 = vmatprep.mubr.msk.f32.mxu0 %vm1073_vm0, %v1072_v0  ;;  %s1108_s14 = sshll.u32 %s1176_s13, 5 }
   0xd   : > { %1003 = vmatprep.subr.mxu1 %v1072_v0  ;;  %1005 = vmatprep.mubr.msk.f32.mxu1 %vm1073_vm0, %v1072_v0  ;;  %s200_s17 = scalar_lea.vmem %s1172_s1, %s1108_s14  ;;  %s195_s20 = scalar_lea.vmem %s1171_s0, %s1108_s14 }
   0xe   : > { %v215_v1 = vld [vmem:[%s200_s17] sm:$0xff]  ;;  %v216_v2 = vld [vmem:[%s200_s17 + $0x8] sm:$0xff]  ;;  %v217_v5 = vld [vmem:[%s200_s17 + $0x10] sm:$0xff]  ;;  %s205_s23 = scalar_lea.vmem %s1173_s2, %s1108_s14  ;;  %s210_s26 = scalar_lea.vmem %s1174_s3, %s1108_s14 }
   0xf   : > { %999 = vmatpush3.xpose.msk.msra.mxu0 %vm223_vm1, %v215_v1  ;;  %v211_v3 = vld [vmem:[%s195_s20] sm:$0xff]  ;;  %1004 = vmatpush3.xpose.msk.msra.mxu1 %vm223_vm1, %v216_v2  ;;  %v212_v4 = vld [vmem:[%s195_s20 + $0x8] sm:$0xff]  ;;  %v218_v6 = vld [vmem:[%s200_s17 + $0x18] sm:$0xff] }
  0x10   : > { %1008 = vmatprep.subr.mxu0 %v1072_v0  ;;  %1013 = vmatprep.subr.mxu1 %v1072_v0  ;;  %v213_v7 = vld [vmem:[%s195_s20 + $0x10] sm:$0xff]  ;;  %v214_v8 = vld [vmem:[%s195_s20 + $0x18] sm:$0xff]  ;;  %v219_v45 = vld [vmem:[%s205_s23] sm:$0xff] }
  0x11   : > { %v220_v46 = vld [vmem:[%s205_s23 + $0x8] sm:$0xff]  ;;  %v221_v53 = vld [vmem:[%s205_s23 + $0x10] sm:$0xff]  ;;  %v222_v57 = vld [vmem:[%s205_s23 + $0x18] sm:$0xff] }
  0x12   : > { %1001 = vmatmul.mubr.msk.f32.vlgmr.msra.gmra.mxu0 %vm223_vm1, %v211_v3  ;;  %1006 = vmatmul.mubr.msk.f32.vlgmr.msra.gmra.mxu1 %vm223_vm1, %v212_v4 }
  0x13   : > { %1009 = vmatpush3.xpose.msk.msra.mxu0 %vm223_vm1, %v217_v5  ;;  %1010 = vmatprep.mubr.msk.f32.mxu0 %vm1073_vm0, %v1072_v0 }
  0x14   : > { %1014 = vmatpush3.xpose.msk.msra.mxu1 %vm223_vm1, %v218_v6  ;;  %1015 = vmatprep.mubr.msk.f32.mxu1 %vm1073_vm0, %v1072_v0 }
  0x15   : > { %1018 = vmatprep.subr.mxu0 %v1072_v0  ;;  %1023 = vmatprep.subr.mxu1 %v1072_v0 }
  0x16   : > { %1011 = vmatmul.mubr.msk.f32.vlgmr.msra.gmra.mxu0 %vm223_vm1, %v213_v7 }
  0x17   : > { %1016 = vmatmul.mubr.msk.f32.vlgmr.msra.gmra.mxu1 %vm223_vm1, %v214_v8  ;;  %1020 = vmatprep.mubr.msk.f32.mxu0 %vm1073_vm0, %v1072_v0 }
  0x18   : > { %1025 = vmatprep.mubr.msk.f32.mxu1 %vm1073_vm0, %v1072_v0  ;;  %1019 = vmatpush3.msra.mxu0 %v219_v45 }
  0x19   : > { %1028 = vmatprep.subr.mxu0 %v1072_v0  ;;  %1024 = vmatpush3.msra.mxu1 %v220_v46 }
  0x1a   : > { %1033 = vmatprep.subr.mxu1 %v1072_v0 }
  0xd2   : > { %v296_v9 = vpop.f32.mrf.mxu0  ;;  %v372_v10 = vpop.f32.mrf.mxu1 }
  0xd3   : > { %v528_v11 = vmul.f32 0.35355338, %v296_v9  ;;  %v529_v12 = vmul.f32 0.35355338, %v372_v10 }
  0xd4   : > { %v1002_v13 = vpop.f32.mrf.mxu0  ;;  %v1007_v14 = vpop.f32.mrf.mxu1 }
  0xd5   : > { %v532_v15 = vsel %vm223_vm1, %v528_v11, -inf  ;;  %v535_v19 = vsel %vm223_vm1, %v529_v12, -inf }
  0xd6   : > { %533 = vmax.xlane.f32.xlu0 %v532_v15  ;;  %v448_v16 = vpop.f32.mrf.mxu0 }
  0xd7   : > { %v530_v17 = vmul.f32 0.35355338, %v448_v16  ;;  %v524_v18 = vpop.f32.mrf.mxu1 }
  0xd8   : > { %v1012_v20 = vpop.f32.mrf.mxu0  ;;  %v531_v21 = vmul.f32 0.35355338, %v524_v18 }
  0xd9   : > { %v538_v22 = vsel %vm223_vm1, %v530_v17, -inf  ;;  %v1017_v23 = vpop.f32.mrf.mxu1 }
  0xda   : > { %536 = vmax.xlane.f32.xlu0 %v535_v19  ;;  %539 = vmax.xlane.f32.xlu1 %v538_v22  ;;  %v541_v24 = vsel %vm223_vm1, %v531_v21, -inf }
  0xde   : > { %542 = vmax.xlane.f32.xlu1 %v541_v24 }
 0x15f   : > { %v534_v25 = vpop.xlane.xlu0 %533 }
 0x160   : > { %v544_v26 = vsub.f32 %v528_v11, %v534_v25 }
 0x162   : > { %v548_v27 = vmul.f32 1.442695, %v544_v26 }
 0x163   : > { %v537_v28 = vpop.xlane.xlu0 %536  ;;  %v540_v29 = vpop.xlane.xlu1 %539 }
 0x164   : > { %1048 = vpow2.f32 %v548_v27  ;;  %v545_v30 = vsub.f32 %v529_v12, %v537_v28  ;;  %v546_v31 = vsub.f32 %v530_v17, %v540_v29 }
 0x166   : > { %v550_v32 = vmul.f32 1.442695, %v545_v30  ;;  %v552_v33 = vmul.f32 1.442695, %v546_v31 }
 0x167   : > { %v543_v34 = vpop.xlane.xlu1 %542 }
 0x168   : > { %1050 = vpow2.f32 %v550_v32  ;;  %v547_v35 = vsub.f32 %v531_v21, %v543_v34 }
 0x169   : > { %1052 = vpow2.f32 %v552_v33 }
 0x16a   : > { %v554_v36 = vmul.f32 1.442695, %v547_v35 }
 0x16c   : > { %1054 = vpow2.f32 %v554_v36 }
 0x171   : > { %v1049_v37 = vpop.eup %1048 }
 0x172   : > { %v556_v38 = vsel %vm223_vm1, %v1049_v37, 0.0 }
 0x173   : > { %557 = vadd.xlane.f32.xlu0 %v556_v38 }
 0x175   : > { %v1051_v39 = vpop.eup %1050 }
 0x176   : > { %v1053_v40 = vpop.eup %1052  ;;  %v559_v41 = vsel %vm223_vm1, %v1051_v39, 0.0 }
 0x177   : > { %560 = vadd.xlane.f32.xlu1 %v559_v41  ;;  %v562_v42 = vsel %vm223_vm1, %v1053_v40, 0.0 }
 0x178   : > { %563 = vadd.xlane.f32.xlu0 %v562_v42 }
 0x179   : > { %v1055_v43 = vpop.eup %1054 }
 0x17a   : > { %v565_v44 = vsel %vm223_vm1, %v1055_v43, 0.0 }
 0x17b   : > { %566 = vadd.xlane.f32.xlu1 %v565_v44 }
 0x1fc   : > { %v558_v47 = vpop.xlane.xlu0 %557 }
 0x1fd   : > { %1056 = vrcp.f32 %v558_v47 }
 0x200   : > { %v561_v48 = vpop.xlane.xlu1 %560 }
 0x201   : > { %v564_v49 = vpop.xlane.xlu0 %563  ;;  %1058 = vrcp.f32 %v561_v48 }
 0x202   : > { %1060 = vrcp.f32 %v564_v49 }
 0x204   : > { %v567_v50 = vpop.xlane.xlu1 %566 }
 0x205   : > { %1062 = vrcp.f32 %v567_v50 }
 0x20a   : > { %v1057_v51 = vpop.eup %1056 }
 0x20b   : > { %v572_v52 = vmul.f32 %v1057_v51, %v1049_v37 }
 0x20d   : > { %1021 = vmatmul.mubr.msk.f32.vlgmr.msra.gmra.mxu0 %vm223_vm1, %v572_v52 }
 0x20e   : > { %v1059_v54 = vpop.eup %1058  ;;  %1029 = vmatpush3.msra.mxu0 %v221_v53  ;;  %1030 = vmatprep.mubr.msk.f32.mxu0 %vm1073_vm0, %v1072_v0 }
 0x20f   : > { %v1061_v55 = vpop.eup %1060  ;;  %v573_v56 = vmul.f32 %v1059_v54, %v1051_v39 }
 0x210   : > { %v574_v58 = vmul.f32 %v1061_v55, %v1053_v40 }
 0x211   : > { %1026 = vmatmul.mubr.msk.f32.vlgmr.msra.gmra.mxu1 %vm223_vm1, %v573_v56 }
 0x212   : > { %v1063_v59 = vpop.eup %1062  ;;  %1031 = vmatmul.mubr.msk.f32.vlgmr.msra.gmra.mxu0 %vm223_vm1, %v574_v58  ;;  %1034 = vmatpush3.msra.mxu1 %v222_v57 }
 0x213   : > { %1035 = vmatprep.mubr.msk.f32.mxu1 %vm1073_vm0, %v1072_v0  ;;  %v575_v60 = vmul.f32 %v1063_v59, %v1055_v43 }
 0x215   : > { %1036 = vmatmul.mubr.msk.f32.vlgmr.msra.gmra.mxu1 %vm223_vm1, %v575_v60 }
 0x2cd   : > { %v645_v61 = vpop.f32.mrf.mxu0 }
 0x2ce   : > { %868 = vst.msk [vmem:[%s210_s26] sm:$0xff] %vm223_vm1, %v645_v61 }
 0x2cf   : > { %v1022_v62 = vpop.f32.mrf.mxu0 }
 0x2d1   : > { %v718_v63 = vpop.f32.mrf.mxu1 }
 0x2d2   : > { %869 = vst.msk [vmem:[%s210_s26 + $0x8] sm:$0xff] %vm223_vm1, %v718_v63  ;;  %v791_v1 = vpop.f32.mrf.mxu0 }
 0x2d3   : > { %870 = vst.msk [vmem:[%s210_s26 + $0x10] sm:$0xff] %vm223_vm1, %v791_v1  ;;  %v1027_v2 = vpop.f32.mrf.mxu1 }
 0x2d4   : > { %v1032_v3 = vpop.f32.mrf.mxu0 }
 0x2d5   : > { %v864_v0 = vpop.f32.mrf.mxu1 }
 0x2d6   : > { %871 = vst.msk [vmem:[%s210_s26 + $0x18] sm:$0xff] %vm223_vm1, %v864_v0 }
 0x2d7   : > { %v1037_v4 = vpop.f32.mrf.mxu1 }
 0x2d8 PF: > { %s13_s12 = sadd.s32 1, %s1070_s12  }
 0x2d9   : > { %p10_p4 = scmp.ge.s32.totalorder %s13_s12, 4  }
 0x2db   :  { %12 = sbr.rel (!%p10_p4) target bundleno = 1 (0x1), region = 68 }

// kernel: decoder_layer.12
= control target key start
LH: loop header
LB: loop body
LE: loop exit
PB: predicated region body
PF: predicated region fallthrough
CT: control target
= control target key end

     0   :  { %vm27_vm0 = vcmask 261120   ;;  %vm109_vm1 = vcmask 523264   ;;  %s185_s1 = inlined_call_operand.vmem [shape: f32[32,64], index: 1, kind: input, shape index: {}]   ;;  %s186_s0 = inlined_call_operand.vmem [shape: f32[16,32], index: 0, kind: input, shape index: {}]   ;;  %s187_s2 = inlined_call_operand.vmem [shape: f32[1,64], index: 2, kind: input, shape index: {}]   ;;  %s188_s3 = inlined_call_operand.vmem [shape: f32[16,64], index: 3, kind: output, shape index: {}]  }
   0x1   :  { %v19_v0 = vld [vmem:[%s185_s1 + $0x18] sm:$0xff]  ;;  %v18_v1 = vld [vmem:[%s185_s1 + $0x10] sm:$0xff]  ;;  %v14_v2 = vld [vmem:[%s186_s0] sm:$0xff] }
   0x2   :  { %125 = vmatprep.subr.mxu0 %v19_v0  ;;  %v17_v3 = vld [vmem:[%s185_s1 + $0x8] sm:$0xff]  ;;  %133 = vmatprep.mubr.msk.f32.mxu0 %vm27_vm0, %v14_v2  ;;  %v16_v4 = vld [vmem:[%s185_s1] sm:$0xff] }
   0x3   :  { %126 = vmatpush3.msra.mxu0 %v19_v0  ;;  %v15_v5 = vld [vmem:[%s186_s0 + $0x8] sm:$0xff]  ;;  %v116_v6 = vld [vmem:[%s187_s2] ss:$0 sm:$0xff] }
   0x4   :  { %127 = vmatprep.subr.mxu0 %v18_v1 }
   0x5   :  { %128 = vmatpush3.msra.mxu0 %v18_v1 }
   0x6   :  { %129 = vmatprep.subr.mxu0 %v17_v3 }
   0x7   :  { %130 = vmatpush3.msra.mxu0 %v17_v3 }
   0x8   :  { %131 = vmatprep.subr.mxu0 %v16_v4 }
   0x9   :  { %132 = vmatpush3.msra.mxu0 %v16_v4 }
   0xa   :  { %134 = vmatmul.mubr.msk.f32.vlgmr.msra.gmra.mxu0 %vm27_vm0, %v15_v5 }
  0xca   :  { %v135_v7 = vpop.f32.mrf.mxu0 }
  0xcb   :  { %v106_v8 = vadd.f32 %v135_v7, %v116_v6 }
  0xcc   :  { %v100_v9 = vpop.f32.mrf.mxu0 }
  0xcd   :  { %111 = vst.msk [vmem:[%s188_s3 + $0x8] sm:$0xff] %vm109_vm1, %v106_v8  ;;  %v101_v10 = vadd.f32 %v116_v6, %v100_v9 }
  0xcf   :  { %110 = vst.msk [vmem:[%s188_s3] sm:$0xff] %vm109_vm1, %v101_v10 }

// kernel: decoder_layer.10
= control target key start
LH: loop header
LB: loop body
LE: loop exit
PB: predicated region body
PF: predicated region fallthrough
CT: control target
= control target key end

     0   :  { %vm36_vm0 = vcmask 261120   ;;  %s281_s1 = inlined_call_operand.vmem [shape: f32[32,32], index: 1, kind: input, shape index: {}]   ;;  %s282_s0 = inlined_call_operand.vmem [shape: f32[16,32], index: 0, kind: input, shape index: {}]   ;;  %s283_s2 = inlined_call_operand.vmem [shape: f32[1,32], index: 2, kind: input, shape index: {}]   ;;  %s284_s3 = inlined_call_operand.vmem [shape: f32[16,32], index: 3, kind: input, shape index: {}]   ;;  %s285_s4 = inlined_call_operand.vmem [shape: f32[1,32], index: 4, kind: input, shape index: {}]   ;;  %s286_s5 = inlined_call_operand.vmem [shape: f32[1,32], index: 5, kind: input, shape index: {}]   ;;  %s287_s6 = inlined_call_operand.vmem [shape: f32[16,32], index: 6, kind: output, shape index: {}]  }
   0x1   :  { %v28_v0 = vld [vmem:[%s281_s1 + $0x18] sm:$0xff]  ;;  %v27_v1 = vld [vmem:[%s281_s1 + $0x10] sm:$0xff]  ;;  %v23_v2 = vld [vmem:[%s282_s0] sm:$0xff] }
   0x2   :  { %184 = vmatprep.subr.mxu0 %v28_v0  ;;  %v26_v3 = vld [vmem:[%s281_s1 + $0x8] sm:$0xff]  ;;  %192 = vmatprep.mubr.msk.f32.mxu0 %vm36_vm0, %v23_v2  ;;  %v25_v4 = vld [vmem:[%s281_s1] sm:$0xff] }
   0x3   :  { %185 = vmatpush3.msra.mxu0 %v28_v0  ;;  %v24_v5 = vld [vmem:[%s282_s0 + $0x8] sm:$0xff]  ;;  %v173_v7 = vld [vmem:[%s283_s2] ss:$0 sm:$0xff] }
   0x4   :  { %186 = vmatprep.subr.mxu0 %v27_v1  ;;  %v118_v9 = vld [vmem:[%s284_s3] sm:$0xff]  ;;  %v119_v12 = vld [vmem:[%s284_s3 + $0x8] sm:$0xff] }
   0x5   :  { %187 = vmatpush3.msra.mxu0 %v27_v1  ;;  %v176_v34 = vld [vmem:[%s285_s4] ss:$0 sm:$0xff] }
   0x6   :  { %188 = vmatprep.subr.mxu0 %v26_v3  ;;  %v177_v36 = vld [vmem:[%s286_s5] ss:$0 sm:$0xff] }
   0x7   :  { %189 = vmatpush3.msra.mxu0 %v26_v3 }
   0x8   :  { %190 = vmatprep.subr.mxu0 %v25_v4 }
   0x9   :  { %191 = vmatpush3.msra.mxu0 %v25_v4 }
   0xa   :  { %193 = vmatmul.mubr.msk.f32.vlgmr.msra.gmra.mxu0 %vm36_vm0, %v24_v5 }
  0xca   :  { %v194_v6 = vpop.f32.mrf.mxu0 }
  0xcb   :  { %v115_v10 = vadd.f32 %v194_v6, %v173_v7 }
  0xcc   :  { %v109_v8 = vpop.f32.mrf.mxu0 }
  0xcd   :  { %v110_v11 = vadd.f32 %v173_v7, %v109_v8  ;;  %v121_v15 = vadd.f32 %v119_v12, %v115_v10 }
  0xcf   :  { %v120_v13 = vadd.f32 %v118_v9, %v110_v11  ;;  %v125_v16 = vsel %vm36_vm0, %v121_v15, 0.0 }
  0xd1   :  { %v122_v14 = vsel %vm36_vm0, %v120_v13, 0.0 }
  0xd2   :  { %123 = vadd.xlane.f32.xlu0 %v122_v14 }
  0xd6   :  { %126 = vadd.xlane.f32.xlu0 %v125_v16 }
 0x15b   :  { %v124_v17 = vpop.xlane.xlu0 %123 }
 0x15c   :  { %v129_v18 = vmul.f32 0.03125, %v124_v17 }
 0x15e   :  { %v131_v19 = vsub.f32 %v120_v13, %v129_v18 }
 0x15f   :  { %v127_v20 = vpop.xlane.xlu0 %126 }
 0x160   :  { %v130_v21 = vmul.f32 0.03125, %v127_v20  ;;  %v133_v22 = vmul.f32 %v131_v19, %v131_v19 }
 0x162   :  { %v132_v23 = vsub.f32 %v121_v15, %v130_v21  ;;  %v135_v24 = vsel %vm36_vm0, %v133_v22, 0.0 }
 0x163   :  { %136 = vadd.xlane.f32.xlu1 %v135_v24 }
 0x164   :  { %v134_v25 = vmul.f32 %v132_v23, %v132_v23 }
 0x166   :  { %v138_v26 = vsel %vm36_vm0, %v134_v25, 0.0 }
 0x167   :  { %139 = vadd.xlane.f32.xlu1 %v138_v26 }
 0x1ec   :  { %v137_v27 = vpop.xlane.xlu1 %136 }
 0x1ed   :  { %v141_v28 = vmul.f32 0.03125, %v137_v27 }
 0x1ef   :  { %v143_v29 = vadd.f32 1e-05, %v141_v28 }
 0x1f0   :  { %v140_v30 = vpop.xlane.xlu1 %139 }
 0x1f1   :  { %195 = vrsqrt.f32 %v143_v29  ;;  %v142_v31 = vmul.f32 0.03125, %v140_v30 }
 0x1f3   :  { %v144_v32 = vadd.f32 1e-05, %v142_v31 }
 0x1f5   :  { %197 = vrsqrt.f32 %v144_v32 }
 0x1fe   :  { %v196_v33 = vpop.eup %195 }
 0x1ff   :  { %v147_v35 = vmul.f32 %v196_v33, %v131_v19 }
 0x201   :  { %v156_v37 = vmul.f32 %v176_v34, %v147_v35 }
 0x202   :  { %v198_v38 = vpop.eup %197 }
 0x203   :  { %v165_v39 = vadd.f32 %v177_v36, %v156_v37  ;;  %v148_v40 = vmul.f32 %v198_v38, %v132_v23 }
 0x205   :  { %167 = vst.msk [vmem:[%s287_s6] sm:$0xff] %vm36_vm0, %v165_v39  ;;  %v157_v41 = vmul.f32 %v176_v34, %v148_v40 }
 0x207   :  { %v166_v42 = vadd.f32 %v177_v36, %v157_v41 }
 0x209   :  { %168 = vst.msk [vmem:[%s287_s6 + $0x8] sm:$0xff] %vm36_vm0, %v166_v42 }

// kernel: decoder_layer.13
= control target key start
LH: loop header
LB: loop body
LE: loop exit
PB: predicated region body
PF: predicated region fallthrough
CT: control target
= control target key end

     0   :  { %10 = vsyncpa [#allocation3], 0  ;;  %s1462_s0 = inlined_call_operand.vmem [shape: f32[2,4,8,8], index: 0, kind: input, shape index: {}]   ;;  %s1463_s1 = inlined_call_operand.vmem [shape: f32[2,4,8,8], index: 1, kind: input, shape index: {}]   ;;  %s1464_s2 = inlined_call_operand.vmem [shape: f32[2,4,8,8], index: 2, kind: input, shape index: {}]   ;;  %s1465_s3 = inlined_call_operand.vmem [shape: f32[2,4,8,8], index: 3, kind: output, shape index: {0}]   ;;  %s1466_s4 = inlined_call_operand.hbm [shape: f32[2,4,8,8], index: 4, kind: output, shape index: {1}]  }
   0x1   :  { %12 = vsyncpa [#allocation3 + $0x1], 0  ;;  %s1289_s15 = smov 0   ;;  %s1291_s16 = smov 0  }
   0x2   :  { %s1293_s17 = smov 0   ;;  %s1295_s18 = smov 0  }
   0x3 LB: > { %s1310_s19 = sadd.s32 4294967295, %s1257_s18   ;;  %s1047_s20 = sadd.s32 4294967294, %s1257_s18   ;;  %s1257_s18 = sphi %s1295_s18, %s1472_s18   ;;  %s1253_s17 = sphi %s1293_s17, %s1471_s17   ;;  %s1249_s16 = sphi %s1291_s16, %s1470_s16   ;;  %s1245_s15 = sphi %s1289_s15, %s1469_s15  }
   0x4   : > { %s1314_s21 = sadd.s32 1, %s1257_s18   ;;  %s129_s22 = sadd.s32 1, %s1253_s17 }
   0x5   : > { %s126_s23 = ssub.s32 %s1257_s18, %s1314_s21  ;;  %p139_p0 = scmp.ne.s32.totalorder %s1253_s17, %s1249_s16 }
   0x6   : > { %p127_p1 = scmp.eq.s32.totalorder %s126_s23, 0  ;;  %p140_p2 = scmp.eq.s32.totalorder %s1310_s19, 1 }
   0x7   : > { %p145_p3 = scmp.ne.s32.totalorder %s1249_s16, %s1245_s15  ;;  %p146_p4 = scmp.eq.s32.totalorder %s1047_s20, 1 }
   0x8   : > { %s1325_s24 = scalar_select %p127_p1, %s1253_s17, %s129_s22  }
   0x9   : > { %p1327_p5 = por %p140_p2, %p139_p0  ;;  %p1331_p6 = por %p146_p4, %p145_p3 }
   0xa   : > { %p1050_p7 = scmp.ge.s32.totalorder %s1257_s18, 1  ;;  %p188_p8 = scmp.lt.s32.totalorder %s1257_s18, 3 }
   0xc   : > { %p189_p9 = pnand %p1050_p7, %p188_p8 }
   0xd   : > { %p229_p10 = scmp.lt.s32.totalorder (!%p189_p9), %s1310_s19, 1  ;;  %s226_s12 = sand.u32 (!%p189_p9), 1, %s1249_s16  }
   0xe   : > { %192 = sbr.rel (%p189_p9) target bundleno = 737 (0x2e1), region = 32  ;;  %s1051_s13 = sshll.u32 (!%p189_p9), %s226_s12, 5 }
   0xf   : > { %s228_s14 = scalar_lea.vmem (!%p189_p9), [#allocation2], %s1051_s13  ;;  %s1081_s20 = sshll.u32 (!%p189_p9), %s1310_s19, 9 }
  0x10   : > { %s936_s22 = sshll.u32 (!%p189_p9), %s228_s14, 4  ;;  %s1408_s29 = scalar_lea.hbm (!%p189_p9), %s1466_s4, %s1081_s20  ;;  %s1410_s22 = int_to_ptr.vmem [resolvable:$true] %s936_s22 }
  0x11   : > { %s1414_s30 = scalar_lea.sflag (!%p189_p9), [#allocation3], %s226_s12 }
  0x13   : > { %v1259_v0 = vmov 0.0   ;;  %vm1260_vm0 = vmmov 0   ;;  %s230_s27 = scalar_select %p229_p10, %s1310_s19, 1  ;;  %vm261_vm1 = vcmask 64512  }
  0x14   : > { %1098 = vmatprep.subr.mxu0 %v1259_v0  ;;  %1100 = vmatprep.mubr.msk.f32.mxu0 %vm1260_vm0, %v1259_v0  ;;  %s1261_s19 = smov [#allocation2]  }
  0x15   : > { %1103 = vmatprep.subr.mxu1 %v1259_v0  ;;  %1105 = vmatprep.mubr.msk.f32.mxu1 %vm1260_vm0, %v1259_v0  ;;  %s1345_s28 = sshll.u32 %s230_s27, 5  ;;  %s1201_s6 = sshll.u32 %s1261_s19, 4  ;;  %s1202_s6 = int_to_ptr.vmem [resolvable:$false] %s1201_s6 }
  0x16   : > { %s238_s5 = scalar_lea.vmem %s1463_s1, %s1345_s28  ;;  %s233_s8 = scalar_lea.vmem %s1462_s0, %s1345_s28 }
  0x17   : > { %v253_v1 = vld [vmem:[%s238_s5] sm:$0xff]  ;;  %v254_v2 = vld [vmem:[%s238_s5 + $0x8] sm:$0xff]  ;;  %v255_v5 = vld [vmem:[%s238_s5 + $0x10] sm:$0xff]  ;;  %s243_s11 = scalar_lea.vmem %s1464_s2, %s1345_s28  ;;  %s1203_s7 = scalar_lea.vmem %s1202_s6, 1024 }
  0x18   : > { %1099 = vmatpush3.xpose.msk.msra.mxu0 %vm261_vm1, %v253_v1  ;;  %v249_v3 = vld [vmem:[%s233_s8] sm:$0xff]  ;;  %1104 = vmatpush3.xpose.msk.msra.mxu1 %vm261_vm1, %v254_v2  ;;  %v250_v4 = vld [vmem:[%s233_s8 + $0x8] sm:$0xff]  ;;  %v256_v6 = vld [vmem:[%s238_s5 + $0x18] sm:$0xff]  ;;  %s1197_s5 = scalar_lea.vmem %s1410_s22, 512  ;;  %p1204_p0 = scmp.lt.s32.totalorder %s1410_s22, %s1202_s6 }
  0x19   : > { %1108 = vmatprep.subr.mxu0 %v1259_v0  ;;  %1113 = vmatprep.subr.mxu1 %v1259_v0  ;;  %v251_v7 = vld [vmem:[%s233_s8 + $0x10] sm:$0xff]  ;;  %v252_v8 = vld [vmem:[%s233_s8 + $0x18] sm:$0xff]  ;;  %v257_v45 = vld [vmem:[%s243_s11] sm:$0xff]  ;;  %p1198_p11 = scmp.ne.s32.totalorder %s1410_s22, %s1197_s5  ;;  %p1205_p1 = scmp.lt.s32.totalorder %s1203_s7, %s1197_s5 }
  0x1a   : > { %v258_v46 = vld [vmem:[%s243_s11 + $0x8] sm:$0xff]  ;;  %v259_v53 = vld [vmem:[%s243_s11 + $0x10] sm:$0xff]  ;;  %v260_v57 = vld [vmem:[%s243_s11 + $0x18] sm:$0xff] }
  0x1b   : > { %1101 = vmatmul.mubr.msk.f32.vlgmr.msra.gmra.mxu0 %vm261_vm1, %v249_v3  ;;  %1106 = vmatmul.mubr.msk.f32.vlgmr.msra.gmra.mxu1 %vm261_vm1, %v250_v4  ;;  %p1199_p12 = pnand %p1198_p11, %p1327_p5  ;;  %p1206_p2 = por %p1205_p1, %p1204_p0 }
  0x1c   : > { %1109 = vmatpush3.xpose.msk.msra.mxu0 %vm261_vm1, %v255_v5  ;;  %1110 = vmatprep.mubr.msk.f32.mxu0 %vm1260_vm0, %v1259_v0 }
  0x1d   : > { %1114 = vmatpush3.xpose.msk.msra.mxu1 %vm261_vm1, %v256_v6  ;;  %1115 = vmatprep.mubr.msk.f32.mxu1 %vm1260_vm0, %v1259_v0  ;;  %p1200_p13 = pneg %p1199_p12 }
  0x1e   : > { %1118 = vmatprep.subr.mxu0 %v1259_v0  ;;  %1123 = vmatprep.subr.mxu1 %v1259_v0 }
  0x1f   : > { %1111 = vmatmul.mubr.msk.f32.vlgmr.msra.gmra.mxu0 %vm261_vm1, %v251_v7  ;;  %p1207_p3 = pnand %p1206_p2, %p1200_p13 }
  0x20   : > { %1116 = vmatmul.mubr.msk.f32.vlgmr.msra.gmra.mxu1 %vm261_vm1, %v252_v8  ;;  %1120 = vmatprep.mubr.msk.f32.mxu0 %vm1260_vm0, %v1259_v0 }
  0x21   : > { %1125 = vmatprep.mubr.msk.f32.mxu1 %vm1260_vm0, %v1259_v0  ;;  %1119 = vmatpush3.msra.mxu0 %v257_v45 }
  0x22   : > { %1128 = vmatprep.subr.mxu0 %v1259_v0  ;;  %1124 = vmatpush3.msra.mxu1 %v258_v46 }
  0x23   : > { %1133 = vmatprep.subr.mxu1 %v1259_v0 }
  0xdb   : > { %v334_v9 = vpop.f32.mrf.mxu0  ;;  %v410_v10 = vpop.f32.mrf.mxu1 }
  0xdc   : > { %v566_v11 = vmul.f32 0.35355338, %v334_v9  ;;  %v567_v12 = vmul.f32 0.35355338, %v410_v10 }
  0xdd   : > { %v1102_v13 = vpop.f32.mrf.mxu0  ;;  %v1107_v14 = vpop.f32.mrf.mxu1 }
  0xde   : > { %v570_v15 = vsel %vm261_vm1, %v566_v11, -inf  ;;  %v573_v19 = vsel %vm261_vm1, %v567_v12, -inf }
  0xdf   : > { %571 = vmax.xlane.f32.xlu0 %v570_v15  ;;  %v486_v16 = vpop.f32.mrf.mxu0 }
  0xe0   : > { %v568_v17 = vmul.f32 0.35355338, %v486_v16  ;;  %v562_v18 = vpop.f32.mrf.mxu1 }
  0xe1   : > { %v1112_v20 = vpop.f32.mrf.mxu0  ;;  %v569_v21 = vmul.f32 0.35355338, %v562_v18 }
  0xe2   : > { %v576_v22 = vsel %vm261_vm1, %v568_v17, -inf  ;;  %v1117_v23 = vpop.f32.mrf.mxu1 }
  0xe3   : > { %574 = vmax.xlane.f32.xlu0 %v573_v19  ;;  %577 = vmax.xlane.f32.xlu1 %v576_v22  ;;  %v579_v24 = vsel %vm261_vm1, %v569_v21, -inf }
  0xe7   : > { %580 = vmax.xlane.f32.xlu1 %v579_v24 }
 0x168   : > { %v572_v25 = vpop.xlane.xlu0 %571 }
 0x169   : > { %v582_v26 = vsub.f32 %v566_v11, %v572_v25 }
 0x16b   : > { %v586_v27 = vmul.f32 1.442695, %v582_v26 }
 0x16c   : > { %v575_v28 = vpop.xlane.xlu0 %574  ;;  %v578_v29 = vpop.xlane.xlu1 %577 }
 0x16d   : > { %1181 = vpow2.f32 %v586_v27  ;;  %v583_v30 = vsub.f32 %v567_v12, %v575_v28  ;;  %v584_v31 = vsub.f32 %v568_v17, %v578_v29 }
 0x16f   : > { %v588_v32 = vmul.f32 1.442695, %v583_v30  ;;  %v590_v33 = vmul.f32 1.442695, %v584_v31 }
 0x170   : > { %v581_v34 = vpop.xlane.xlu1 %580 }
 0x171   : > { %1183 = vpow2.f32 %v588_v32  ;;  %v585_v35 = vsub.f32 %v569_v21, %v581_v34 }
 0x172   : > { %1185 = vpow2.f32 %v590_v33 }
 0x173   : > { %v592_v36 = vmul.f32 1.442695, %v585_v35 }
 0x175   : > { %1187 = vpow2.f32 %v592_v36 }
 0x17a   : > { %v1182_v37 = vpop.eup %1181 }
 0x17b   : > { %v594_v38 = vsel %vm261_vm1, %v1182_v37, 0.0 }
 0x17c   : > { %595 = vadd.xlane.f32.xlu0 %v594_v38 }
 0x17e   : > { %v1184_v39 = vpop.eup %1183 }
 0x17f   : > { %v1186_v40 = vpop.eup %1185  ;;  %v597_v41 = vsel %vm261_vm1, %v1184_v39, 0.0 }
 0x180   : > { %598 = vadd.xlane.f32.xlu1 %v597_v41  ;;  %v600_v42 = vsel %vm261_vm1, %v1186_v40, 0.0 }
 0x181   : > { %601 = vadd.xlane.f32.xlu0 %v600_v42 }
 0x182   : > { %v1188_v43 = vpop.eup %1187 }
 0x183   : > { %v603_v44 = vsel %vm261_vm1, %v1188_v43, 0.0 }
 0x184   : > { %604 = vadd.xlane.f32.xlu1 %v603_v44 }
 0x205   : > { %v596_v47 = vpop.xlane.xlu0 %595 }
 0x206   : > { %1189 = vrcp.f32 %v596_v47 }
 0x209   : > { %v599_v48 = vpop.xlane.xlu1 %598 }
 0x20a   : > { %v602_v49 = vpop.xlane.xlu0 %601  ;;  %1191 = vrcp.f32 %v599_v48 }
 0x20b   : > { %1193 = vrcp.f32 %v602_v49 }
 0x20d   : > { %v605_v50 = vpop.xlane.xlu1 %604 }
 0x20e   : > { %1195 = vrcp.f32 %v605_v50 }
 0x213   : > { %v1190_v51 = vpop.eup %1189 }
 0x214   : > { %v610_v52 = vmul.f32 %v1190_v51, %v1182_v37 }
 0x216   : > { %1121 = vmatmul.mubr.msk.f32.vlgmr.msra.gmra.mxu0 %vm261_vm1, %v610_v52  ;;  %906 = vst.msk [vmem:[%s228_s14] sm:$0xff] %vm261_vm1, %v610_v52 }
 0x217   : > { %v1192_v54 = vpop.eup %1191  ;;  %1129 = vmatpush3.msra.mxu0 %v259_v53  ;;  %1130 = vmatprep.mubr.msk.f32.mxu0 %vm1260_vm0, %v1259_v0 }
 0x218   : > { %v1194_v55 = vpop.eup %1193  ;;  %v611_v56 = vmul.f32 %v1192_v54, %v1184_v39 }
 0x219   : > { %v612_v58 = vmul.f32 %v1194_v55, %v1186_v40 }
 0x21a   : > { %1126 = vmatmul.mubr.msk.f32.vlgmr.msra.gmra.mxu1 %vm261_vm1, %v611_v56  ;;  %907 = vst.msk [vmem:[%s228_s14 + $0x8] sm:$0xff] %vm261_vm1, %v611_v56 }
 0x21b   : > { %v1196_v59 = vpop.eup %1195  ;;  %1131 = vmatmul.mubr.msk.f32.vlgmr.msra.gmra.mxu0 %vm261_vm1, %v612_v58  ;;  %908 = vst.msk [vmem:[%s228_s14 + $0x10] sm:$0xff] %vm261_vm1, %v612_v58  ;;  %1134 = vmatpush3.msra.mxu1 %v260_v57 }
 0x21c   : > { %1135 = vmatprep.mubr.msk.f32.mxu1 %vm1260_vm0, %v1259_v0  ;;  %v613_v60 = vmul.f32 %v1196_v59, %v1188_v43 }
 0x21e   : > { %1136 = vmatmul.mubr.msk.f32.vlgmr.msra.gmra.mxu1 %vm261_vm1, %v613_v60  ;;  %909 = vst.msk [vmem:[%s228_s14 + $0x18] sm:$0xff] %vm261_vm1, %v613_v60 }
 0x21f   : > { %1210 = shalt.err (!%p1207_p3)
}
 0x220   : > { %s1211_s8 = scalar_lea.hbm %s1408_s29, 512  ;;  %s1215_s11 = scalar_lea.hbm %s1466_s4, 1024 }
 0x221   : > { %p1212_p4 = scmp.ne.s32.totalorder %s1408_s29, %s1211_s8  ;;  %p1216_p9 = scmp.lt.s32.totalorder %s1408_s29, %s1466_s4 }
 0x222   : > { %p1217_p10 = scmp.lt.s32.totalorder %s1215_s11, %s1211_s8 }
 0x223   : > { %p1213_p7 = pnand %p1212_p4, %p1327_p5 }
 0x224   : > { %p1218_p11 = por %p1217_p10, %p1216_p9 }
 0x225   : > { %p1214_p8 = pneg %p1213_p7 }
 0x227   : > { %p1219_p12 = pnand %p1218_p11, %p1214_p8 }
 0x229   : > { %1222 = shalt.err (!%p1219_p12)
}
 0x22a   : > { %s1262_s14 = smov 128   ;;  %s1263_s20 = smov 8  }
 0x22b   : > { %1138 = dma.vmem_to_hbm [thread:$0]  (%p1327_p5), %s1410_s22, 512, %s1408_s29, %s1414_s30, %s1262_s14, %s1262_s14, %s1263_s20  }
 0x22c   : > { %s248_s5 = scalar_lea.vmem %s1465_s3, %s1345_s28 }
 0x2d6   : > { %v683_v61 = vpop.f32.mrf.mxu0 }
 0x2d7   : > { %910 = vst.msk [vmem:[%s248_s5] sm:$0xff] %vm261_vm1, %v683_v61 }
 0x2d8   : > { %v1122_v62 = vpop.f32.mrf.mxu0 }
 0x2da   : > { %v756_v63 = vpop.f32.mrf.mxu1 }
 0x2db   : > { %911 = vst.msk [vmem:[%s248_s5 + $0x8] sm:$0xff] %vm261_vm1, %v756_v63  ;;  %v829_v0 = vpop.f32.mrf.mxu0 }
 0x2dc   : > { %912 = vst.msk [vmem:[%s248_s5 + $0x10] sm:$0xff] %vm261_vm1, %v829_v0  ;;  %v1127_v1 = vpop.f32.mrf.mxu1 }
 0x2dd   : > { %v1132_v2 = vpop.f32.mrf.mxu0 }
 0x2de   : > { %v902_v3 = vpop.f32.mrf.mxu1 }
 0x2df   : > { %913 = vst.msk [vmem:[%s248_s5 + $0x18] sm:$0xff] %vm261_vm1, %v902_v3 }
 0x2e0   : > { %v1137_v4 = vpop.f32.mrf.mxu1 }
 0x2e1 PF: > { %p1144_p5 = scmp.ge.s32.totalorder %s1257_s18, 2  ;;  %s959_s25 = sand.u32 1, %s1245_s15  }
 0x2e2   : > { %s960_s28 = scalar_lea.sflag [#allocation3], %s959_s25 }
 0x2e3   : > { %p1141_p13 = pnand %p1144_p5, %p1331_p6 }
 0x2e5   : > { %p1142_p0 = pneg %p1141_p13 }
 0x2e7   : > { %1240 = dma.done.wait (%p1142_p0), %s960_s28, 512  }
 0x2e8   : > { %1242 = vsyncadd (%p1142_p0), %s960_s28, 4294966784  ;;  %p15_p1 = scmp.ge.s32.totalorder %s1314_s21, 4   ;;  %s1469_s15 = smov %s1249_s16 }
 0x2e9   : > { %s1470_s16 = smov %s1253_s17  ;;  %s1471_s17 = smov %s1325_s24 }
 0x2ea   : > { %s1472_s18 = smov %s1314_s21  ;;  %17 = sbr.rel (!%p15_p1) target bundleno = 3 (0x3), region = 85 }
 0x2ef   :  { %965 = vsyncpa [#allocation3], 1 }
 0x2f0   :  { %967 = vsyncpa [#allocation3 + $0x1], 1 }

// kernel: decoder_layer.15
= control target key start
LH: loop header
LB: loop body
LE: loop exit
PB: predicated region body
PF: predicated region fallthrough
CT: control target
= control target key end

     0   :  { %vm31_vm0 = vcmask 261120   ;;  %s505_s0 = inlined_call_operand.vmem [shape: f32[16,32], index: 0, kind: input, shape index: {}]   ;;  %s506_s1 = inlined_call_operand.vmem [shape: f32[32,64], index: 1, kind: input, shape index: {}]   ;;  %s507_s2 = inlined_call_operand.vmem [shape: f32[1,64], index: 2, kind: input, shape index: {}]   ;;  %s508_s3 = inlined_call_operand.vmem [shape: f32[64,32], index: 3, kind: input, shape index: {}]   ;;  %s509_s4 = inlined_call_operand.vmem [shape: f32[1,32], index: 4, kind: input, shape index: {}]   ;;  %s510_s5 = inlined_call_operand.vmem [shape: f32[1,32], index: 5, kind: input, shape index: {}]   ;;  %s511_s6 = inlined_call_operand.vmem [shape: f32[1,32], index: 6, kind: input, shape index: {}]   ;;  %s512_s7 = inlined_call_operand.hbm [shape: f32[16,32], index: 7, kind: output, shape index: {}]  }
   0x1   :  { %v39_v0 = vld [vmem:[%s506_s1 + $0x18] sm:$0xff]  ;;  %v38_v1 = vld [vmem:[%s506_s1 + $0x10] sm:$0xff]  ;;  %v34_v2 = vld [vmem:[%s505_s0] sm:$0xff] }
   0x2   :  { %332 = vmatprep.subr.mxu0 %v39_v0  ;;  %v37_v3 = vld [vmem:[%s506_s1 + $0x8] sm:$0xff]  ;;  %340 = vmatprep.mubr.msk.f32.mxu0 %vm31_vm0, %v34_v2  ;;  %v140_v4 = vld [vmem:[%s508_s3 + $0x38] sm:$0xff]  ;;  %v139_v5 = vld [vmem:[%s508_s3 + $0x30] sm:$0xff] }
   0x3   :  { %333 = vmatpush3.msra.mxu0 %v39_v0  ;;  %343 = vmatprep.subr.mxu1 %v140_v4 }
   0x4   :  { %334 = vmatprep.subr.mxu0 %v38_v1 }
   0x5   :  { %12 = vsyncpa [#allocation4], 0  ;;  %335 = vmatpush3.msra.mxu0 %v38_v1  ;;  %v36_v6 = vld [vmem:[%s506_s1] sm:$0xff]  ;;  %344 = vmatpush3.msra.mxu1 %v140_v4  ;;  %v138_v7 = vld [vmem:[%s508_s3 + $0x28] sm:$0xff]  ;;  %v392_v14 = vmov 0.0   ;;  %vm141_vm1 = vcmask 523264  }
   0x6   :  { %336 = vmatprep.subr.mxu0 %v37_v3  ;;  %345 = vmatprep.subr.mxu1 %v139_v5  ;;  %v35_v8 = vld [vmem:[%s505_s0 + $0x8] sm:$0xff]  ;;  %v137_v9 = vld [vmem:[%s508_s3 + $0x20] sm:$0xff]  ;;  %v136_v10 = vld [vmem:[%s508_s3 + $0x18] sm:$0xff]  ;;  %33 = vst.msk [vmem:[#allocation2 + $0x8] sm:$0xff] %vm31_vm0, %v392_v14  ;;  %s393_s9 = smov [#allocation3]  }
   0x7   :  { %337 = vmatpush3.msra.mxu0 %v37_v3  ;;  %346 = vmatpush3.msra.mxu1 %v139_v5  ;;  %v135_v11 = vld [vmem:[%s508_s3 + $0x10] sm:$0xff]  ;;  %v134_v12 = vld [vmem:[%s508_s3 + $0x8] sm:$0xff]  ;;  %v133_v13 = vld [vmem:[%s508_s3] sm:$0xff]  ;;  %32 = vst.msk [vmem:[#allocation2] sm:$0xff] %vm31_vm0, %v392_v14  ;;  %s297_s10 = sshll.u32 %s393_s9, 4  ;;  %s298_s10 = int_to_ptr.vmem [resolvable:$true] %s297_s10 }
   0x8   :  { %338 = vmatprep.subr.mxu0 %v36_v6  ;;  %347 = vmatprep.subr.mxu1 %v138_v7  ;;  %v308_v15 = vld [vmem:[%s507_s2] ss:$0 sm:$0xff]  ;;  %s370_s11 = scalar_lea.vmem %s298_s10, 256  ;;  %p375_p1 = scmp.lt.s32.totalorder %s298_s10, %s298_s10 }
   0x9   :  { %339 = vmatpush3.msra.mxu0 %v36_v6  ;;  %348 = vmatpush3.msra.mxu1 %v138_v7  ;;  %v313_v32 = vld [vmem:[%s509_s4] ss:$0 sm:$0xff]  ;;  %p371_p0 = scmp.ne.s32.totalorder %s298_s10, %s370_s11  ;;  %p376_p2 = scmp.lt.s32.totalorder %s370_s11, %s370_s11 }
   0xa   :  { %341 = vmatmul.mubr.msk.f32.vlgmr.msra.gmra.mxu0 %vm31_vm0, %v35_v8  ;;  %349 = vmatprep.subr.mxu1 %v137_v9  ;;  %v314_v54 = vld [vmem:[%s510_s5] ss:$0 sm:$0xff] }
   0xb   :  { %350 = vmatpush3.msra.mxu1 %v137_v9  ;;  %v315_v56 = vld [vmem:[%s511_s6] ss:$0 sm:$0xff]  ;;  %p377_p3 = por %p376_p2, %p375_p1 }
   0xc   :  { %351 = vmatprep.subr.mxu1 %v136_v10 }
   0xd   :  { %352 = vmatpush3.msra.mxu1 %v136_v10  ;;  %v132_v22 = vld [vmem:[#allocation2 + $0x8] sm:$0xff]  ;;  %p378_p4 = pnand %p377_p3, %p371_p0 }
   0xe   :  { %353 = vmatprep.subr.mxu1 %v135_v11  ;;  %v131_v24 = vld [vmem:[#allocation2] sm:$0xff] }
   0xf   :  { %354 = vmatpush3.msra.mxu1 %v135_v11 }
  0x10   :  { %355 = vmatprep.subr.mxu1 %v134_v12 }
  0x11   :  { %356 = vmatpush3.msra.mxu1 %v134_v12 }
  0x12   :  { %357 = vmatprep.subr.mxu1 %v133_v13 }
  0x13   :  { %358 = vmatpush3.msra.mxu1 %v133_v13 }
  0xca   :  { %v342_v16 = vpop.f32.mrf.mxu0 }
  0xcb   :  { %v126_v17 = vadd.f32 %v342_v16, %v308_v15 }
  0xcc   :  { %v120_v18 = vpop.f32.mrf.mxu0 }
  0xcd   :  { %v121_v19 = vadd.f32 %v308_v15, %v120_v18  ;;  %v130_v21 = vmax.f32 %v126_v17, 0.0 }
  0xcf   :  { %v129_v20 = vmax.f32 %v121_v19, 0.0 }
  0xd1   :  { %359 = vmatprep.mubr.msk.f32.mxu1 %vm141_vm1, %v129_v20 }
  0xd2   :  { %360 = vmatmul.mubr.msk.f32.vlgmr.msra.gmra.mxu1 %vm141_vm1, %v130_v21 }
 0x192   :  { %v361_v23 = vpop.f32.mrf.mxu1 }
 0x193   :  { %v224_v25 = vadd.f32 %v361_v23, %v132_v22 }
 0x194   :  { %v214_v26 = vpop.f32.mrf.mxu1 }
 0x195   :  { %226 = vst.msk [vmem:[#allocation2 + $0x8] sm:$0xff] %vm31_vm0, %v224_v25  ;;  %v223_v27 = vadd.f32 %v214_v26, %v131_v24 }
 0x197   :  { %225 = vst.msk [vmem:[#allocation2] sm:$0xff] %vm31_vm0, %v223_v27 }
 0x19c   :  { %v233_v28 = vld [vmem:[#allocation2 + $0x8] sm:$0xff] }
 0x19d   :  { %v235_v31 = vadd.f32 %v233_v28, %v35_v8 }
 0x19e   :  { %v232_v29 = vld [vmem:[#allocation2] sm:$0xff] }
 0x19f   :  { %v234_v30 = vadd.f32 %v232_v29, %v34_v2  ;;  %v244_v35 = vadd.f32 %v313_v32, %v235_v31 }
 0x1a1   :  { %v243_v33 = vadd.f32 %v313_v32, %v234_v30  ;;  %v248_v36 = vsel %vm31_vm0, %v244_v35, 0.0 }
 0x1a3   :  { %v245_v34 = vsel %vm31_vm0, %v243_v33, 0.0 }
 0x1a4   :  { %246 = vadd.xlane.f32.xlu0 %v245_v34 }
 0x1a8   :  { %249 = vadd.xlane.f32.xlu0 %v248_v36 }
 0x22d   :  { %v247_v37 = vpop.xlane.xlu0 %246 }
 0x22e   :  { %v252_v38 = vmul.f32 0.03125, %v247_v37 }
 0x230   :  { %v254_v39 = vsub.f32 %v243_v33, %v252_v38 }
 0x231   :  { %v250_v40 = vpop.xlane.xlu0 %249 }
 0x232   :  { %v253_v41 = vmul.f32 0.03125, %v250_v40  ;;  %v256_v42 = vmul.f32 %v254_v39, %v254_v39 }
 0x234   :  { %v255_v43 = vsub.f32 %v244_v35, %v253_v41  ;;  %v258_v44 = vsel %vm31_vm0, %v256_v42, 0.0 }
 0x235   :  { %259 = vadd.xlane.f32.xlu1 %v258_v44 }
 0x236   :  { %v257_v45 = vmul.f32 %v255_v43, %v255_v43 }
 0x238   :  { %v261_v46 = vsel %vm31_vm0, %v257_v45, 0.0 }
 0x239   :  { %262 = vadd.xlane.f32.xlu1 %v261_v46 }
 0x2be   :  { %v260_v47 = vpop.xlane.xlu1 %259 }
 0x2bf   :  { %v264_v48 = vmul.f32 0.03125, %v260_v47 }
 0x2c1   :  { %v266_v49 = vadd.f32 1e-05, %v264_v48 }
 0x2c2   :  { %v263_v50 = vpop.xlane.xlu1 %262 }
 0x2c3   :  { %366 = vrsqrt.f32 %v266_v49  ;;  %v265_v51 = vmul.f32 0.03125, %v263_v50 }
 0x2c5   :  { %v267_v52 = vadd.f32 1e-05, %v265_v51 }
 0x2c7   :  { %368 = vrsqrt.f32 %v267_v52 }
 0x2d0   :  { %v367_v53 = vpop.eup %366 }
 0x2d1   :  { %v270_v55 = vmul.f32 %v367_v53, %v254_v39 }
 0x2d3   :  { %v279_v57 = vmul.f32 %v314_v54, %v270_v55 }
 0x2d4   :  { %v369_v58 = vpop.eup %368 }
 0x2d5   :  { %v271_v59 = vmul.f32 %v369_v58, %v255_v43  ;;  %v288_v60 = vadd.f32 %v315_v56, %v279_v57 }
 0x2d7   :  { %v280_v61 = vmul.f32 %v314_v54, %v271_v59  ;;  %290 = vst.msk [vmem:[#allocation3] sm:$0xff] %vm31_vm0, %v288_v60 }
 0x2d9   :  { %v289_v62 = vadd.f32 %v315_v56, %v280_v61 }
 0x2db   :  { %291 = vst.msk [vmem:[#allocation3 + $0x8] sm:$0xff] %vm31_vm0, %v289_v62 }
 0x2dc   :  { %381 = shalt.err (!%p378_p4)
}
 0x2dd   :  { %s394_s5 = smov 128   ;;  %s395_s6 = smov 8  }
 0x2de   :  { %303 = dma.vmem_to_hbm [thread:$0]  %s298_s10, 256, %s512_s7, [#allocation4], %s394_s5, %s394_s5, %s395_s6  }
 0x2df   :  { %390 = dma.done.wait [#allocation4], 256  }
 0x2e0   :  { %391 = vsyncadd [#allocation4], 4294967040 }
 0x2e1   :  { %307 = vsyncpa [#allocation4], 1 }

</bundles_post_ra>
